<compile_context>
chip_gen: v7x
topology: tpu7x:2x2x1
jax: 0.10.0
libtpu: 0.0.40
codegen_flags: <defaults>
</compile_context>

<pallas_src>
import jax
import jax.numpy as jnp
from jax.experimental import pallas as pl
from jax.experimental.pallas import tpu as pltpu

INPUT_DIM = 8     # == LATENT_DIM (required for the reference broadcast to work)
LATENT_DIM = 8
HIDDEN_DIM = 32
N = 8             # n = x.shape[0] is both sequence length and batch size in the reference

K_PAD = 56        # padded contraction dim of the fused weight pages (max natural K = 49)
N_PAD = 32        # padded output dim of the fused weight pages


def _vrnn_kernel(w_ref, stream_ref, state_ref, out_ref):
    f32 = jnp.float32
    seq, n, sw = stream_ref.shape                 # static
    d = sw // 3                                   # latent_dim == input_dim
    d_h = (state_ref.shape[1] - 2 * d) // 3       # hidden_dim
    kp = w_ref.shape[1]                           # padded contraction dim

    # Initial states: one small VMEM read, lane-sliced (all within one lane tile).
    st = state_ref[...]
    h_in = st[:, 0 * d_h:1 * d_h]
    h_lat = st[:, 1 * d_h:2 * d_h]
    h_out = st[:, 2 * d_h:3 * d_h]
    z = st[:, 3 * d_h:3 * d_h + d]
    tmp = st[:, 3 * d_h + d:3 * d_h + 2 * d]      # reference's torch.randn tmp at i == 0

    # Affine tails [1, 0, 0, ...]: the leading 1 multiplies the bias row of each weight
    # page; the zeros hit the zero-padded rows.  Hoisted once (single vreg).
    iota = jax.lax.broadcasted_iota(jnp.int32, (n, kp - d_h), 1)
    tail24 = jnp.where(iota == 0, f32(1.0), f32(0.0))      # width kp - d_h      = 24
    tail16 = tail24[:, :kp - d - d_h]                       # width kp - d - d_h  = 16
    tail8 = tail24[:, :kp - 2 * d - d_h]                    # width kp - 2d - d_h = 8

    preds = []
    for i in range(seq):                          # fully unrolled: seq is static
        step = stream_ref[i]                      # (n, 3*d): [x_i | noise_z_i | noise_x_i]
        xi = step[:, 0 * d:1 * d]
        nz = step[:, 1 * d:2 * d]
        nx = step[:, 2 * d:3 * d]

        # hidden_input = rnn_xh(x[i], hidden_input)  -- one fused dot, bias folded in
        lhs = jnp.concatenate([xi, h_in, tail16], axis=1)           # (n, 56)
        h_in = jnp.tanh(jnp.dot(lhs, w_ref[0], preferred_element_type=f32))

        # hidden_latent = rnn_hz(z, hidden_latent)
        lhs = jnp.concatenate([z, h_lat, tail16], axis=1)
        h_lat = jnp.tanh(jnp.dot(lhs, w_ref[1], preferred_element_type=f32))

        # mean_z / log_var_z share one dot (weights lane-concatenated in the wrapper)
        lhs = jnp.concatenate([h_lat, tail24], axis=1)
        mlv = jnp.dot(lhs, w_ref[2], preferred_element_type=f32)
        z = jnp.exp(mlv[:, d:2 * d]) * nz + mlv[:, :d]

        # hidden_output = rnn_zh(cat(z, tmp), hidden_output) -- concat folded into K
        lhs = jnp.concatenate([z, tmp, h_out, tail8], axis=1)
        h_out = jnp.tanh(jnp.dot(lhs, w_ref[3], preferred_element_type=f32))

        # mean_x; log_var_x = mean_x reproduces the reference's reuse of mlp_x_mean
        lhs = jnp.concatenate([h_out, tail24], axis=1)
        mean_x = jnp.dot(lhs, w_ref[4], preferred_element_type=f32)[:, :d]
        preds.append(jnp.exp(mean_x) * nx + mean_x)

        tmp = xi                                  # tmp = x[i-1] for the next step

    # Single lane-concat + single store -> one output slab DMA, no per-step masked vst.
    out_ref[...] = jnp.concatenate(preds, axis=1)                   # (n, seq*d)


def neural_volatility_forward(x, params, noises):
    """x: (seq, n, input_dim) f32. Returns stacked preds: (seq, n, input_dim) f32."""
    seq, n, d_in = x.shape
    assert d_in == LATENT_DIM, "reference broadcast requires input_dim == latent_dim"

    def page(parts, bias):
        # Stack per-input weight blocks along K, append the bias as one more K row
        # (matched by the ones column in the kernel LHS), zero-pad to (K_PAD, N_PAD).
        w = jnp.concatenate(list(parts) + [bias], axis=0)
        return jnp.pad(w, ((0, K_PAD - w.shape[0]), (0, N_PAD - w.shape[1])))

    weights = jnp.stack([
        page([params["w_xh_i"], params["w_xh_h"]], params["b_xh"]),
        page([params["w_hz_i"], params["w_hz_h"]], params["b_hz"]),
        page([jnp.concatenate([params["w_zm"], params["w_zv"]], axis=1)],
             jnp.concatenate([params["b_zm"], params["b_zv"]], axis=1)),
        page([params["w_zh_z"], params["w_zh_x"], params["w_zh_h"]], params["b_zh"]),
        page([params["w_xm"]], params["b_xm"]),
    ], axis=0)                                                    # (5, K_PAD, N_PAD)

    stream = jnp.concatenate(
        [x, noises["noise_z"], noises["noise_x"]], axis=-1)       # (seq, n, 3*d)
    state = jnp.concatenate(
        [noises["h_in0"], noises["h_lat0"], noises["h_out0"],
         noises["z0"], noises["tmp0"]], axis=-1)                  # (n, 3*hidden + 2*d)

    vmem_spec = pl.BlockSpec(memory_space=pltpu.MemorySpace.VMEM)
    out = pl.pallas_call(
        _vrnn_kernel,
        out_shape=jax.ShapeDtypeStruct((n, seq * d_in), jnp.float32),
        in_specs=[vmem_spec] * 3,
        out_specs=vmem_spec,
    )(weights, stream, state)

    # (n, seq*d) -> (seq, n, d); tiny (2 KiB) reshape/transpose outside the kernel.
    return jnp.transpose(out.reshape(n, seq, d_in), (1, 0, 2))


def _init_params(key):
    """Deterministic init mimicking PyTorch's uniform(-1/sqrt(fan_in), 1/sqrt(fan_in))."""
    def u(k, shape, fan_in):
        b = 1.0 / jnp.sqrt(float(fan_in))
        return jax.random.uniform(k, shape, jnp.float32, -b, b)

    ks = jax.random.split(key, 24)
    d_i, d_l, d_h = INPUT_DIM, LATENT_DIM, HIDDEN_DIM
    p = {}
    # rnn_xh: RNNCell(input_dim, hidden_dim); weights stored pre-transposed (in, out)
    p["w_xh_i"] = u(ks[0], (d_i, d_h), d_h)
    p["w_xh_h"] = u(ks[1], (d_h, d_h), d_h)
    p["b_xh"] = u(ks[2], (1, d_h), d_h) + u(ks[3], (1, d_h), d_h)   # b_ih + b_hh
    # rnn_hz (input sized to latent_dim; see TODO above)
    p["w_hz_i"] = u(ks[4], (d_l, d_h), d_h)
    p["w_hz_h"] = u(ks[5], (d_h, d_h), d_h)
    p["b_hz"] = u(ks[6], (1, d_h), d_h) + u(ks[7], (1, d_h), d_h)
    # mlp_z_mean / mlp_z_log_var: Linear(hidden_dim, latent_dim)
    p["w_zm"] = u(ks[8], (d_h, d_l), d_h)
    p["b_zm"] = u(ks[9], (1, d_l), d_h)
    p["w_zv"] = u(ks[10], (d_h, d_l), d_h)
    p["b_zv"] = u(ks[11], (1, d_l), d_h)
    # rnn_zh: RNNCell(latent_dim + input_dim, hidden_dim); input weight split z/x halves
    p["w_zh_z"] = u(ks[12], (d_l, d_h), d_h)
    p["w_zh_x"] = u(ks[13], (d_i, d_h), d_h)
    p["w_zh_h"] = u(ks[14], (d_h, d_h), d_h)
    p["b_zh"] = u(ks[15], (1, d_h), d_h) + u(ks[16], (1, d_h), d_h)
    # mlp_x_mean: Linear(hidden_dim, input_dim)
    p["w_xm"] = u(ks[17], (d_h, d_i), d_h)
    p["b_xm"] = u(ks[18], (1, d_i), d_h)
    # mlp_x_log_var is declared in __init__ but never used in forward; initialized, unused.
    p["w_xv_unused"] = u(ks[19], (d_h, d_i), d_h)
    p["b_xv_unused"] = u(ks[20], (1, d_i), d_h)
    return p


def _make_noises(key, seq, n):
    ks = jax.random.split(key, 7)
    return {
        "h_in0": jax.random.normal(ks[0], (n, HIDDEN_DIM), jnp.float32),
        "h_lat0": jax.random.normal(ks[1], (n, HIDDEN_DIM), jnp.float32),
        "h_out0": jax.random.normal(ks[2], (n, HIDDEN_DIM), jnp.float32),
        "z0": jax.random.normal(ks[3], (n, LATENT_DIM), jnp.float32),
        "noise_z": jax.random.normal(ks[4], (seq, n, LATENT_DIM), jnp.float32),
        "noise_x": jax.random.normal(ks[5], (seq, n, LATENT_DIM), jnp.float32),
        "tmp0": jax.random.normal(ks[6], (n, INPUT_DIM), jnp.float32),
    }


def _reference_forward(x, params, noises):
    """Pure-JAX reference mirroring the PyTorch loop (full-f32 matmuls), for validation."""
    hi = jax.lax.Precision.HIGHEST
    dot = lambda a, b: jnp.dot(a, b, precision=hi)
    seq = x.shape[0]
    h_in, h_lat, h_out = noises["h_in0"], noises["h_lat0"], noises["h_out0"]
    z = noises["z0"]
    preds = []
    for i in range(seq):
        h_in = jnp.tanh(dot(x[i], params["w_xh_i"]) + dot(h_in, params["w_xh_h"])
                        + params["b_xh"])
        h_lat = jnp.tanh(dot(z, params["w_hz_i"]) + dot(h_lat, params["w_hz_h"])
                         + params["b_hz"])
        mean_z = dot(h_lat, params["w_zm"]) + params["b_zm"]
        log_var_z = dot(h_lat, params["w_zv"]) + params["b_zv"]
        z = jnp.exp(log_var_z) * noises["noise_z"][i] + mean_z
        tmp = noises["tmp0"] if i == 0 else x[i - 1]
        h_out = jnp.tanh(dot(z, params["w_zh_z"]) + dot(tmp, params["w_zh_x"])
                         + dot(h_out, params["w_zh_h"]) + params["b_zh"])
        mean_x = dot(h_out, params["w_xm"]) + params["b_xm"]
        log_var_x = mean_x  # reference bug reproduced
        preds.append(jnp.exp(log_var_x) * noises["noise_x"][i] + mean_x)
    return jnp.stack(preds, axis=0)


if __name__ == "__main__":
    key = jax.random.PRNGKey(0)
    k_x, k_p, k_n = jax.random.split(key, 3)

    x = jax.random.normal(k_x, (N, N, INPUT_DIM), jnp.float32)  # (seq=n, batch=n, input_dim)
    params = _init_params(k_p)
    noises = _make_noises(k_n, N, N)

    out = jax.block_until_ready(neural_volatility_forward(x, params, noises))

    ref = _reference_forward(x, params, noises)
    assert out.shape == (N, N, INPUT_DIM)
    assert jnp.allclose(out, ref, rtol=1e-4, atol=1e-4), "mismatch vs pure-JAX reference"

    print("KERNEL_OK")
</pallas_src>

<mosaic_0001>
module attributes {stable_mosaic.version = 11 : i64} {
  func.func @_vrnn_kernel(%arg0: memref<5x56x32xf32, #tpu.memory_space<vmem>>, %arg1: memref<8x8x24xf32, #tpu.memory_space<vmem>>, %arg2: memref<8x112xf32, #tpu.memory_space<vmem>>, %arg3: memref<8x64xf32, #tpu.memory_space<vmem>>) attributes {dimension_semantics = [], scalar_prefetch = 0 : i64, scratch_operands = 0 : i64, tpu.core_type = #tpu.core_type<tc>} {
    %c0 = arith.constant 0 : index
    %c0_0 = arith.constant 0 : index
    %0 = vector.load %arg2[%c0, %c0_0] : memref<8x112xf32, #tpu.memory_space<vmem>>, vector<8x112xf32>
    %1 = vector.extract_strided_slice %0 {offsets = [0, 32], sizes = [8, 32], strides = [1, 1]} : vector<8x112xf32> to vector<8x32xf32>
    %2 = vector.extract_strided_slice %0 {offsets = [0, 64], sizes = [8, 32], strides = [1, 1]} : vector<8x112xf32> to vector<8x32xf32>
    %3 = vector.extract_strided_slice %0 {offsets = [0, 96], sizes = [8, 8], strides = [1, 1]} : vector<8x112xf32> to vector<8x8xf32>
    %4 = vector.extract_strided_slice %0 {offsets = [0, 104], sizes = [8, 8], strides = [1, 1]} : vector<8x112xf32> to vector<8x8xf32>
    %5 = tpu.iota {dimensions = array<i32: 1>} : vector<8x24xi32>
    %c0_i32 = arith.constant 0 : i32
    %6 = vector.broadcast %c0_i32 : i32 to vector<8x24xi32>
    %7 = arith.cmpi eq, %5, %6 : vector<8x24xi32>
    %cst = arith.constant 1.000000e+00 : f32
    %cst_1 = arith.constant 0.000000e+00 : f32
    %8 = vector.broadcast %cst : f32 to vector<8x24xf32>
    %9 = vector.broadcast %cst_1 : f32 to vector<8x24xf32>
    %10 = arith.select %7, %8, %9 : vector<8x24xi1>, vector<8x24xf32>
    %11 = vector.extract_strided_slice %10 {offsets = [0, 0], sizes = [8, 16], strides = [1, 1]} : vector<8x24xf32> to vector<8x16xf32>
    %12 = vector.extract_strided_slice %10 {offsets = [0, 0], sizes = [8, 8], strides = [1, 1]} : vector<8x24xf32> to vector<8x8xf32>
    %c0_2 = arith.constant 0 : index
    %c0_3 = arith.constant 0 : index
    %c0_4 = arith.constant 0 : index
    %13 = vector.load %arg1[%c0_2, %c0_3, %c0_4] : memref<8x8x24xf32, #tpu.memory_space<vmem>>, vector<1x8x24xf32>
    %14 = vector.shape_cast %13 : vector<1x8x24xf32> to vector<8x24xf32>
    %15 = vector.extract_strided_slice %14 {offsets = [0, 0], sizes = [8, 8], strides = [1, 1]} : vector<8x24xf32> to vector<8x8xf32>
    %16 = vector.extract_strided_slice %14 {offsets = [0, 8], sizes = [8, 8], strides = [1, 1]} : vector<8x24xf32> to vector<8x8xf32>
    %17 = vector.extract_strided_slice %14 {offsets = [0, 16], sizes = [8, 8], strides = [1, 1]} : vector<8x24xf32> to vector<8x8xf32>
    %18 = tpu.concatenate %3, %1, %11 in 1 : vector<8x8xf32>, vector<8x32xf32>, vector<8x16xf32> -> vector<8x56xf32>
    %c1 = arith.constant 1 : index
    %c0_5 = arith.constant 0 : index
    %c0_6 = arith.constant 0 : index
    %19 = vector.load %arg0[%c1, %c0_5, %c0_6] : memref<5x56x32xf32, #tpu.memory_space<vmem>>, vector<1x56x32xf32>
    %20 = vector.shape_cast %19 : vector<1x56x32xf32> to vector<56x32xf32>
    %cst_7 = arith.constant dense<0.000000e+00> : vector<8x32xf32>
    %21 = tpu.matmul %18, %20, %cst_7 {dimension_numbers = #tpu.dot_dimension_numbers<[1], [0], [0], [1], [0, 0, 1, 1], [], []>} : vector<8x56xf32>, vector<56x32xf32>, vector<8x32xf32> -> vector<8x32xf32>
    %22 = math.tanh %21 : vector<8x32xf32>
    %23 = tpu.concatenate %22, %10 in 1 : vector<8x32xf32>, vector<8x24xf32> -> vector<8x56xf32>
    %c2 = arith.constant 2 : index
    %c0_8 = arith.constant 0 : index
    %c0_9 = arith.constant 0 : index
    %24 = vector.load %arg0[%c2, %c0_8, %c0_9] : memref<5x56x32xf32, #tpu.memory_space<vmem>>, vector<1x56x32xf32>
    %25 = vector.shape_cast %24 : vector<1x56x32xf32> to vector<56x32xf32>
    %cst_10 = arith.constant dense<0.000000e+00> : vector<8x32xf32>
    %26 = tpu.matmul %23, %25, %cst_10 {dimension_numbers = #tpu.dot_dimension_numbers<[1], [0], [0], [1], [0, 0, 1, 1], [], []>} : vector<8x56xf32>, vector<56x32xf32>, vector<8x32xf32> -> vector<8x32xf32>
    %27 = vector.extract_strided_slice %26 {offsets = [0, 8], sizes = [8, 8], strides = [1, 1]} : vector<8x32xf32> to vector<8x8xf32>
    %28 = math.exp %27 : vector<8x8xf32>
    %29 = arith.mulf %28, %16 : vector<8x8xf32>
    %30 = vector.extract_strided_slice %26 {offsets = [0, 0], sizes = [8, 8], strides = [1, 1]} : vector<8x32xf32> to vector<8x8xf32>
    %31 = arith.addf %29, %30 : vector<8x8xf32>
    %32 = tpu.concatenate %31, %4, %2, %12 in 1 : vector<8x8xf32>, vector<8x8xf32>, vector<8x32xf32>, vector<8x8xf32> -> vector<8x56xf32>
    %c3 = arith.constant 3 : index
    %c0_11 = arith.constant 0 : index
    %c0_12 = arith.constant 0 : index
    %33 = vector.load %arg0[%c3, %c0_11, %c0_12] : memref<5x56x32xf32, #tpu.memory_space<vmem>>, vector<1x56x32xf32>
    %34 = vector.shape_cast %33 : vector<1x56x32xf32> to vector<56x32xf32>
    %cst_13 = arith.constant dense<0.000000e+00> : vector<8x32xf32>
    %35 = tpu.matmul %32, %34, %cst_13 {dimension_numbers = #tpu.dot_dimension_numbers<[1], [0], [0], [1], [0, 0, 1, 1], [], []>} : vector<8x56xf32>, vector<56x32xf32>, vector<8x32xf32> -> vector<8x32xf32>
    %36 = math.tanh %35 : vector<8x32xf32>
    %37 = tpu.concatenate %36, %10 in 1 : vector<8x32xf32>, vector<8x24xf32> -> vector<8x56xf32>
    %c4 = arith.constant 4 : index
    %c0_14 = arith.constant 0 : index
    %c0_15 = arith.constant 0 : index
    %38 = vector.load %arg0[%c4, %c0_14, %c0_15] : memref<5x56x32xf32, #tpu.memory_space<vmem>>, vector<1x56x32xf32>
    %39 = vector.shape_cast %38 : vector<1x56x32xf32> to vector<56x32xf32>
    %cst_16 = arith.constant dense<0.000000e+00> : vector<8x32xf32>
    %40 = tpu.matmul %37, %39, %cst_16 {dimension_numbers = #tpu.dot_dimension_numbers<[1], [0], [0], [1], [0, 0, 1, 1], [], []>} : vector<8x56xf32>, vector<56x32xf32>, vector<8x32xf32> -> vector<8x32xf32>
    %41 = vector.extract_strided_slice %40 {offsets = [0, 0], sizes = [8, 8], strides = [1, 1]} : vector<8x32xf32> to vector<8x8xf32>
    %42 = math.exp %41 : vector<8x8xf32>
    %43 = arith.mulf %42, %17 : vector<8x8xf32>
    %44 = arith.addf %43, %41 : vector<8x8xf32>
    %c1_17 = arith.constant 1 : index
    %c0_18 = arith.constant 0 : index
    %c0_19 = arith.constant 0 : index
    %45 = vector.load %arg1[%c1_17, %c0_18, %c0_19] : memref<8x8x24xf32, #tpu.memory_space<vmem>>, vector<1x8x24xf32>
    %46 = vector.shape_cast %45 : vector<1x8x24xf32> to vector<8x24xf32>
    %47 = vector.extract_strided_slice %46 {offsets = [0, 0], sizes = [8, 8], strides = [1, 1]} : vector<8x24xf32> to vector<8x8xf32>
    %48 = vector.extract_strided_slice %46 {offsets = [0, 8], sizes = [8, 8], strides = [1, 1]} : vector<8x24xf32> to vector<8x8xf32>
    %49 = vector.extract_strided_slice %46 {offsets = [0, 16], sizes = [8, 8], strides = [1, 1]} : vector<8x24xf32> to vector<8x8xf32>
    %50 = tpu.concatenate %31, %22, %11 in 1 : vector<8x8xf32>, vector<8x32xf32>, vector<8x16xf32> -> vector<8x56xf32>
    %c1_20 = arith.constant 1 : index
    %c0_21 = arith.constant 0 : index
    %c0_22 = arith.constant 0 : index
    %51 = vector.load %arg0[%c1_20, %c0_21, %c0_22] : memref<5x56x32xf32, #tpu.memory_space<vmem>>, vector<1x56x32xf32>
    %52 = vector.shape_cast %51 : vector<1x56x32xf32> to vector<56x32xf32>
    %cst_23 = arith.constant dense<0.000000e+00> : vector<8x32xf32>
    %53 = tpu.matmul %50, %52, %cst_23 {dimension_numbers = #tpu.dot_dimension_numbers<[1], [0], [0], [1], [0, 0, 1, 1], [], []>} : vector<8x56xf32>, vector<56x32xf32>, vector<8x32xf32> -> vector<8x32xf32>
    %54 = math.tanh %53 : vector<8x32xf32>
    %55 = tpu.concatenate %54, %10 in 1 : vector<8x32xf32>, vector<8x24xf32> -> vector<8x56xf32>
    %c2_24 = arith.constant 2 : index
    %c0_25 = arith.constant 0 : index
    %c0_26 = arith.constant 0 : index
    %56 = vector.load %arg0[%c2_24, %c0_25, %c0_26] : memref<5x56x32xf32, #tpu.memory_space<vmem>>, vector<1x56x32xf32>
    %57 = vector.shape_cast %56 : vector<1x56x32xf32> to vector<56x32xf32>
    %cst_27 = arith.constant dense<0.000000e+00> : vector<8x32xf32>
    %58 = tpu.matmul %55, %57, %cst_27 {dimension_numbers = #tpu.dot_dimension_numbers<[1], [0], [0], [1], [0, 0, 1, 1], [], []>} : vector<8x56xf32>, vector<56x32xf32>, vector<8x32xf32> -> vector<8x32xf32>
    %59 = vector.extract_strided_slice %58 {offsets = [0, 8], sizes = [8, 8], strides = [1, 1]} : vector<8x32xf32> to vector<8x8xf32>
    %60 = math.exp %59 : vector<8x8xf32>
    %61 = arith.mulf %60, %48 : vector<8x8xf32>
    %62 = vector.extract_strided_slice %58 {offsets = [0, 0], sizes = [8, 8], strides = [1, 1]} : vector<8x32xf32> to vector<8x8xf32>
    %63 = arith.addf %61, %62 : vector<8x8xf32>
    %64 = tpu.concatenate %63, %15, %36, %12 in 1 : vector<8x8xf32>, vector<8x8xf32>, vector<8x32xf32>, vector<8x8xf32> -> vector<8x56xf32>
    %c3_28 = arith.constant 3 : index
    %c0_29 = arith.constant 0 : index
    %c0_30 = arith.constant 0 : index
    %65 = vector.load %arg0[%c3_28, %c0_29, %c0_30] : memref<5x56x32xf32, #tpu.memory_space<vmem>>, vector<1x56x32xf32>
    %66 = vector.shape_cast %65 : vector<1x56x32xf32> to vector<56x32xf32>
    %cst_31 = arith.constant dense<0.000000e+00> : vector<8x32xf32>
    %67 = tpu.matmul %64, %66, %cst_31 {dimension_numbers = #tpu.dot_dimension_numbers<[1], [0], [0], [1], [0, 0, 1, 1], [], []>} : vector<8x56xf32>, vector<56x32xf32>, vector<8x32xf32> -> vector<8x32xf32>
    %68 = math.tanh %67 : vector<8x32xf32>
    %69 = tpu.concatenate %68, %10 in 1 : vector<8x32xf32>, vector<8x24xf32> -> vector<8x56xf32>
    %c4_32 = arith.constant 4 : index
    %c0_33 = arith.constant 0 : index
    %c0_34 = arith.constant 0 : index
    %70 = vector.load %arg0[%c4_32, %c0_33, %c0_34] : memref<5x56x32xf32, #tpu.memory_space<vmem>>, vector<1x56x32xf32>
    %71 = vector.shape_cast %70 : vector<1x56x32xf32> to vector<56x32xf32>
    %cst_35 = arith.constant dense<0.000000e+00> : vector<8x32xf32>
    %72 = tpu.matmul %69, %71, %cst_35 {dimension_numbers = #tpu.dot_dimension_numbers<[1], [0], [0], [1], [0, 0, 1, 1], [], []>} : vector<8x56xf32>, vector<56x32xf32>, vector<8x32xf32> -> vector<8x32xf32>
    %73 = vector.extract_strided_slice %72 {offsets = [0, 0], sizes = [8, 8], strides = [1, 1]} : vector<8x32xf32> to vector<8x8xf32>
    %74 = math.exp %73 : vector<8x8xf32>
    %75 = arith.mulf %74, %49 : vector<8x8xf32>
    %76 = arith.addf %75, %73 : vector<8x8xf32>
    %c2_36 = arith.constant 2 : index
    %c0_37 = arith.constant 0 : index
    %c0_38 = arith.constant 0 : index
    %77 = vector.load %arg1[%c2_36, %c0_37, %c0_38] : memref<8x8x24xf32, #tpu.memory_space<vmem>>, vector<1x8x24xf32>
    %78 = vector.shape_cast %77 : vector<1x8x24xf32> to vector<8x24xf32>
    %79 = vector.extract_strided_slice %78 {offsets = [0, 0], sizes = [8, 8], strides = [1, 1]} : vector<8x24xf32> to vector<8x8xf32>
    %80 = vector.extract_strided_slice %78 {offsets = [0, 8], sizes = [8, 8], strides = [1, 1]} : vector<8x24xf32> to vector<8x8xf32>
    %81 = vector.extract_strided_slice %78 {offsets = [0, 16], sizes = [8, 8], strides = [1, 1]} : vector<8x24xf32> to vector<8x8xf32>
    %82 = tpu.concatenate %63, %54, %11 in 1 : vector<8x8xf32>, vector<8x32xf32>, vector<8x16xf32> -> vector<8x56xf32>
    %c1_39 = arith.constant 1 : index
    %c0_40 = arith.constant 0 : index
    %c0_41 = arith.constant 0 : index
    %83 = vector.load %arg0[%c1_39, %c0_40, %c0_41] : memref<5x56x32xf32, #tpu.memory_space<vmem>>, vector<1x56x32xf32>
    %84 = vector.shape_cast %83 : vector<1x56x32xf32> to vector<56x32xf32>
    %cst_42 = arith.constant dense<0.000000e+00> : vector<8x32xf32>
    %85 = tpu.matmul %82, %84, %cst_42 {dimension_numbers = #tpu.dot_dimension_numbers<[1], [0], [0], [1], [0, 0, 1, 1], [], []>} : vector<8x56xf32>, vector<56x32xf32>, vector<8x32xf32> -> vector<8x32xf32>
    %86 = math.tanh %85 : vector<8x32xf32>
    %87 = tpu.concatenate %86, %10 in 1 : vector<8x32xf32>, vector<8x24xf32> -> vector<8x56xf32>
    %c2_43 = arith.constant 2 : index
    %c0_44 = arith.constant 0 : index
    %c0_45 = arith.constant 0 : index
    %88 = vector.load %arg0[%c2_43, %c0_44, %c0_45] : memref<5x56x32xf32, #tpu.memory_space<vmem>>, vector<1x56x32xf32>
    %89 = vector.shape_cast %88 : vector<1x56x32xf32> to vector<56x32xf32>
    %cst_46 = arith.constant dense<0.000000e+00> : vector<8x32xf32>
    %90 = tpu.matmul %87, %89, %cst_46 {dimension_numbers = #tpu.dot_dimension_numbers<[1], [0], [0], [1], [0, 0, 1, 1], [], []>} : vector<8x56xf32>, vector<56x32xf32>, vector<8x32xf32> -> vector<8x32xf32>
    %91 = vector.extract_strided_slice %90 {offsets = [0, 8], sizes = [8, 8], strides = [1, 1]} : vector<8x32xf32> to vector<8x8xf32>
    %92 = math.exp %91 : vector<8x8xf32>
    %93 = arith.mulf %92, %80 : vector<8x8xf32>
    %94 = vector.extract_strided_slice %90 {offsets = [0, 0], sizes = [8, 8], strides = [1, 1]} : vector<8x32xf32> to vector<8x8xf32>
    %95 = arith.addf %93, %94 : vector<8x8xf32>
    %96 = tpu.concatenate %95, %47, %68, %12 in 1 : vector<8x8xf32>, vector<8x8xf32>, vector<8x32xf32>, vector<8x8xf32> -> vector<8x56xf32>
    %c3_47 = arith.constant 3 : index
    %c0_48 = arith.constant 0 : index
    %c0_49 = arith.constant 0 : index
    %97 = vector.load %arg0[%c3_47, %c0_48, %c0_49] : memref<5x56x32xf32, #tpu.memory_space<vmem>>, vector<1x56x32xf32>
    %98 = vector.shape_cast %97 : vector<1x56x32xf32> to vector<56x32xf32>
    %cst_50 = arith.constant dense<0.000000e+00> : vector<8x32xf32>
    %99 = tpu.matmul %96, %98, %cst_50 {dimension_numbers = #tpu.dot_dimension_numbers<[1], [0], [0], [1], [0, 0, 1, 1], [], []>} : vector<8x56xf32>, vector<56x32xf32>, vector<8x32xf32> -> vector<8x32xf32>
    %100 = math.tanh %99 : vector<8x32xf32>
    %101 = tpu.concatenate %100, %10 in 1 : vector<8x32xf32>, vector<8x24xf32> -> vector<8x56xf32>
    %c4_51 = arith.constant 4 : index
    %c0_52 = arith.constant 0 : index
    %c0_53 = arith.constant 0 : index
    %102 = vector.load %arg0[%c4_51, %c0_52, %c0_53] : memref<5x56x32xf32, #tpu.memory_space<vmem>>, vector<1x56x32xf32>
    %103 = vector.shape_cast %102 : vector<1x56x32xf32> to vector<56x32xf32>
    %cst_54 = arith.constant dense<0.000000e+00> : vector<8x32xf32>
    %104 = tpu.matmul %101, %103, %cst_54 {dimension_numbers = #tpu.dot_dimension_numbers<[1], [0], [0], [1], [0, 0, 1, 1], [], []>} : vector<8x56xf32>, vector<56x32xf32>, vector<8x32xf32> -> vector<8x32xf32>
    %105 = vector.extract_strided_slice %104 {offsets = [0, 0], sizes = [8, 8], strides = [1, 1]} : vector<8x32xf32> to vector<8x8xf32>
    %106 = math.exp %105 : vector<8x8xf32>
    %107 = arith.mulf %106, %81 : vector<8x8xf32>
    %108 = arith.addf %107, %105 : vector<8x8xf32>
    %c3_55 = arith.constant 3 : index
    %c0_56 = arith.constant 0 : index
    %c0_57 = arith.constant 0 : index
    %109 = vector.load %arg1[%c3_55, %c0_56, %c0_57] : memref<8x8x24xf32, #tpu.memory_space<vmem>>, vector<1x8x24xf32>
    %110 = vector.shape_cast %109 : vector<1x8x24xf32> to vector<8x24xf32>
    %111 = vector.extract_strided_slice %110 {offsets = [0, 0], sizes = [8, 8], strides = [1, 1]} : vector<8x24xf32> to vector<8x8xf32>
    %112 = vector.extract_strided_slice %110 {offsets = [0, 8], sizes = [8, 8], strides = [1, 1]} : vector<8x24xf32> to vector<8x8xf32>
    %113 = vector.extract_strided_slice %110 {offsets = [0, 16], sizes = [8, 8], strides = [1, 1]} : vector<8x24xf32> to vector<8x8xf32>
    %114 = tpu.concatenate %95, %86, %11 in 1 : vector<8x8xf32>, vector<8x32xf32>, vector<8x16xf32> -> vector<8x56xf32>
    %c1_58 = arith.constant 1 : index
    %c0_59 = arith.constant 0 : index
    %c0_60 = arith.constant 0 : index
    %115 = vector.load %arg0[%c1_58, %c0_59, %c0_60] : memref<5x56x32xf32, #tpu.memory_space<vmem>>, vector<1x56x32xf32>
    %116 = vector.shape_cast %115 : vector<1x56x32xf32> to vector<56x32xf32>
    %cst_61 = arith.constant dense<0.000000e+00> : vector<8x32xf32>
    %117 = tpu.matmul %114, %116, %cst_61 {dimension_numbers = #tpu.dot_dimension_numbers<[1], [0], [0], [1], [0, 0, 1, 1], [], []>} : vector<8x56xf32>, vector<56x32xf32>, vector<8x32xf32> -> vector<8x32xf32>
    %118 = math.tanh %117 : vector<8x32xf32>
    %119 = tpu.concatenate %118, %10 in 1 : vector<8x32xf32>, vector<8x24xf32> -> vector<8x56xf32>
    %c2_62 = arith.constant 2 : index
    %c0_63 = arith.constant 0 : index
    %c0_64 = arith.constant 0 : index
    %120 = vector.load %arg0[%c2_62, %c0_63, %c0_64] : memref<5x56x32xf32, #tpu.memory_space<vmem>>, vector<1x56x32xf32>
    %121 = vector.shape_cast %120 : vector<1x56x32xf32> to vector<56x32xf32>
    %cst_65 = arith.constant dense<0.000000e+00> : vector<8x32xf32>
    %122 = tpu.matmul %119, %121, %cst_65 {dimension_numbers = #tpu.dot_dimension_numbers<[1], [0], [0], [1], [0, 0, 1, 1], [], []>} : vector<8x56xf32>, vector<56x32xf32>, vector<8x32xf32> -> vector<8x32xf32>
    %123 = vector.extract_strided_slice %122 {offsets = [0, 8], sizes = [8, 8], strides = [1, 1]} : vector<8x32xf32> to vector<8x8xf32>
    %124 = math.exp %123 : vector<8x8xf32>
    %125 = arith.mulf %124, %112 : vector<8x8xf32>
    %126 = vector.extract_strided_slice %122 {offsets = [0, 0], sizes = [8, 8], strides = [1, 1]} : vector<8x32xf32> to vector<8x8xf32>
    %127 = arith.addf %125, %126 : vector<8x8xf32>
    %128 = tpu.concatenate %127, %79, %100, %12 in 1 : vector<8x8xf32>, vector<8x8xf32>, vector<8x32xf32>, vector<8x8xf32> -> vector<8x56xf32>
    %c3_66 = arith.constant 3 : index
    %c0_67 = arith.constant 0 : index
    %c0_68 = arith.constant 0 : index
    %129 = vector.load %arg0[%c3_66, %c0_67, %c0_68] : memref<5x56x32xf32, #tpu.memory_space<vmem>>, vector<1x56x32xf32>
    %130 = vector.shape_cast %129 : vector<1x56x32xf32> to vector<56x32xf32>
    %cst_69 = arith.constant dense<0.000000e+00> : vector<8x32xf32>
    %131 = tpu.matmul %128, %130, %cst_69 {dimension_numbers = #tpu.dot_dimension_numbers<[1], [0], [0], [1], [0, 0, 1, 1], [], []>} : vector<8x56xf32>, vector<56x32xf32>, vector<8x32xf32> -> vector<8x32xf32>
    %132 = math.tanh %131 : vector<8x32xf32>
    %133 = tpu.concatenate %132, %10 in 1 : vector<8x32xf32>, vector<8x24xf32> -> vector<8x56xf32>
    %c4_70 = arith.constant 4 : index
    %c0_71 = arith.constant 0 : index
    %c0_72 = arith.constant 0 : index
    %134 = vector.load %arg0[%c4_70, %c0_71, %c0_72] : memref<5x56x32xf32, #tpu.memory_space<vmem>>, vector<1x56x32xf32>
    %135 = vector.shape_cast %134 : vector<1x56x32xf32> to vector<56x32xf32>
    %cst_73 = arith.constant dense<0.000000e+00> : vector<8x32xf32>
    %136 = tpu.matmul %133, %135, %cst_73 {dimension_numbers = #tpu.dot_dimension_numbers<[1], [0], [0], [1], [0, 0, 1, 1], [], []>} : vector<8x56xf32>, vector<56x32xf32>, vector<8x32xf32> -> vector<8x32xf32>
    %137 = vector.extract_strided_slice %136 {offsets = [0, 0], sizes = [8, 8], strides = [1, 1]} : vector<8x32xf32> to vector<8x8xf32>
    %138 = math.exp %137 : vector<8x8xf32>
    %139 = arith.mulf %138, %113 : vector<8x8xf32>
    %140 = arith.addf %139, %137 : vector<8x8xf32>
    %c4_74 = arith.constant 4 : index
    %c0_75 = arith.constant 0 : index
    %c0_76 = arith.constant 0 : index
    %141 = vector.load %arg1[%c4_74, %c0_75, %c0_76] : memref<8x8x24xf32, #tpu.memory_space<vmem>>, vector<1x8x24xf32>
    %142 = vector.shape_cast %141 : vector<1x8x24xf32> to vector<8x24xf32>
    %143 = vector.extract_strided_slice %142 {offsets = [0, 0], sizes = [8, 8], strides = [1, 1]} : vector<8x24xf32> to vector<8x8xf32>
    %144 = vector.extract_strided_slice %142 {offsets = [0, 8], sizes = [8, 8], strides = [1, 1]} : vector<8x24xf32> to vector<8x8xf32>
    %145 = vector.extract_strided_slice %142 {offsets = [0, 16], sizes = [8, 8], strides = [1, 1]} : vector<8x24xf32> to vector<8x8xf32>
    %146 = tpu.concatenate %127, %118, %11 in 1 : vector<8x8xf32>, vector<8x32xf32>, vector<8x16xf32> -> vector<8x56xf32>
    %c1_77 = arith.constant 1 : index
    %c0_78 = arith.constant 0 : index
    %c0_79 = arith.constant 0 : index
    %147 = vector.load %arg0[%c1_77, %c0_78, %c0_79] : memref<5x56x32xf32, #tpu.memory_space<vmem>>, vector<1x56x32xf32>
    %148 = vector.shape_cast %147 : vector<1x56x32xf32> to vector<56x32xf32>
    %cst_80 = arith.constant dense<0.000000e+00> : vector<8x32xf32>
    %149 = tpu.matmul %146, %148, %cst_80 {dimension_numbers = #tpu.dot_dimension_numbers<[1], [0], [0], [1], [0, 0, 1, 1], [], []>} : vector<8x56xf32>, vector<56x32xf32>, vector<8x32xf32> -> vector<8x32xf32>
    %150 = math.tanh %149 : vector<8x32xf32>
    %151 = tpu.concatenate %150, %10 in 1 : vector<8x32xf32>, vector<8x24xf32> -> vector<8x56xf32>
    %c2_81 = arith.constant 2 : index
    %c0_82 = arith.constant 0 : index
    %c0_83 = arith.constant 0 : index
    %152 = vector.load %arg0[%c2_81, %c0_82, %c0_83] : memref<5x56x32xf32, #tpu.memory_space<vmem>>, vector<1x56x32xf32>
    %153 = vector.shape_cast %152 : vector<1x56x32xf32> to vector<56x32xf32>
    %cst_84 = arith.constant dense<0.000000e+00> : vector<8x32xf32>
    %154 = tpu.matmul %151, %153, %cst_84 {dimension_numbers = #tpu.dot_dimension_numbers<[1], [0], [0], [1], [0, 0, 1, 1], [], []>} : vector<8x56xf32>, vector<56x32xf32>, vector<8x32xf32> -> vector<8x32xf32>
    %155 = vector.extract_strided_slice %154 {offsets = [0, 8], sizes = [8, 8], strides = [1, 1]} : vector<8x32xf32> to vector<8x8xf32>
    %156 = math.exp %155 : vector<8x8xf32>
    %157 = arith.mulf %156, %144 : vector<8x8xf32>
    %158 = vector.extract_strided_slice %154 {offsets = [0, 0], sizes = [8, 8], strides = [1, 1]} : vector<8x32xf32> to vector<8x8xf32>
    %159 = arith.addf %157, %158 : vector<8x8xf32>
    %160 = tpu.concatenate %159, %111, %132, %12 in 1 : vector<8x8xf32>, vector<8x8xf32>, vector<8x32xf32>, vector<8x8xf32> -> vector<8x56xf32>
    %c3_85 = arith.constant 3 : index
    %c0_86 = arith.constant 0 : index
    %c0_87 = arith.constant 0 : index
    %161 = vector.load %arg0[%c3_85, %c0_86, %c0_87] : memref<5x56x32xf32, #tpu.memory_space<vmem>>, vector<1x56x32xf32>
    %162 = vector.shape_cast %161 : vector<1x56x32xf32> to vector<56x32xf32>
    %cst_88 = arith.constant dense<0.000000e+00> : vector<8x32xf32>
    %163 = tpu.matmul %160, %162, %cst_88 {dimension_numbers = #tpu.dot_dimension_numbers<[1], [0], [0], [1], [0, 0, 1, 1], [], []>} : vector<8x56xf32>, vector<56x32xf32>, vector<8x32xf32> -> vector<8x32xf32>
    %164 = math.tanh %163 : vector<8x32xf32>
    %165 = tpu.concatenate %164, %10 in 1 : vector<8x32xf32>, vector<8x24xf32> -> vector<8x56xf32>
    %c4_89 = arith.constant 4 : index
    %c0_90 = arith.constant 0 : index
    %c0_91 = arith.constant 0 : index
    %166 = vector.load %arg0[%c4_89, %c0_90, %c0_91] : memref<5x56x32xf32, #tpu.memory_space<vmem>>, vector<1x56x32xf32>
    %167 = vector.shape_cast %166 : vector<1x56x32xf32> to vector<56x32xf32>
    %cst_92 = arith.constant dense<0.000000e+00> : vector<8x32xf32>
    %168 = tpu.matmul %165, %167, %cst_92 {dimension_numbers = #tpu.dot_dimension_numbers<[1], [0], [0], [1], [0, 0, 1, 1], [], []>} : vector<8x56xf32>, vector<56x32xf32>, vector<8x32xf32> -> vector<8x32xf32>
    %169 = vector.extract_strided_slice %168 {offsets = [0, 0], sizes = [8, 8], strides = [1, 1]} : vector<8x32xf32> to vector<8x8xf32>
    %170 = math.exp %169 : vector<8x8xf32>
    %171 = arith.mulf %170, %145 : vector<8x8xf32>
    %172 = arith.addf %171, %169 : vector<8x8xf32>
    %c5 = arith.constant 5 : index
    %c0_93 = arith.constant 0 : index
    %c0_94 = arith.constant 0 : index
    %173 = vector.load %arg1[%c5, %c0_93, %c0_94] : memref<8x8x24xf32, #tpu.memory_space<vmem>>, vector<1x8x24xf32>
    %174 = vector.shape_cast %173 : vector<1x8x24xf32> to vector<8x24xf32>
    %175 = vector.extract_strided_slice %174 {offsets = [0, 0], sizes = [8, 8], strides = [1, 1]} : vector<8x24xf32> to vector<8x8xf32>
    %176 = vector.extract_strided_slice %174 {offsets = [0, 8], sizes = [8, 8], strides = [1, 1]} : vector<8x24xf32> to vector<8x8xf32>
    %177 = vector.extract_strided_slice %174 {offsets = [0, 16], sizes = [8, 8], strides = [1, 1]} : vector<8x24xf32> to vector<8x8xf32>
    %178 = tpu.concatenate %159, %150, %11 in 1 : vector<8x8xf32>, vector<8x32xf32>, vector<8x16xf32> -> vector<8x56xf32>
    %c1_95 = arith.constant 1 : index
    %c0_96 = arith.constant 0 : index
    %c0_97 = arith.constant 0 : index
    %179 = vector.load %arg0[%c1_95, %c0_96, %c0_97] : memref<5x56x32xf32, #tpu.memory_space<vmem>>, vector<1x56x32xf32>
    %180 = vector.shape_cast %179 : vector<1x56x32xf32> to vector<56x32xf32>
    %cst_98 = arith.constant dense<0.000000e+00> : vector<8x32xf32>
    %181 = tpu.matmul %178, %180, %cst_98 {dimension_numbers = #tpu.dot_dimension_numbers<[1], [0], [0], [1], [0, 0, 1, 1], [], []>} : vector<8x56xf32>, vector<56x32xf32>, vector<8x32xf32> -> vector<8x32xf32>
    %182 = math.tanh %181 : vector<8x32xf32>
    %183 = tpu.concatenate %182, %10 in 1 : vector<8x32xf32>, vector<8x24xf32> -> vector<8x56xf32>
    %c2_99 = arith.constant 2 : index
    %c0_100 = arith.constant 0 : index
    %c0_101 = arith.constant 0 : index
    %184 = vector.load %arg0[%c2_99, %c0_100, %c0_101] : memref<5x56x32xf32, #tpu.memory_space<vmem>>, vector<1x56x32xf32>
    %185 = vector.shape_cast %184 : vector<1x56x32xf32> to vector<56x32xf32>
    %cst_102 = arith.constant dense<0.000000e+00> : vector<8x32xf32>
    %186 = tpu.matmul %183, %185, %cst_102 {dimension_numbers = #tpu.dot_dimension_numbers<[1], [0], [0], [1], [0, 0, 1, 1], [], []>} : vector<8x56xf32>, vector<56x32xf32>, vector<8x32xf32> -> vector<8x32xf32>
    %187 = vector.extract_strided_slice %186 {offsets = [0, 8], sizes = [8, 8], strides = [1, 1]} : vector<8x32xf32> to vector<8x8xf32>
    %188 = math.exp %187 : vector<8x8xf32>
    %189 = arith.mulf %188, %176 : vector<8x8xf32>
    %190 = vector.extract_strided_slice %186 {offsets = [0, 0], sizes = [8, 8], strides = [1, 1]} : vector<8x32xf32> to vector<8x8xf32>
    %191 = arith.addf %189, %190 : vector<8x8xf32>
    %192 = tpu.concatenate %191, %143, %164, %12 in 1 : vector<8x8xf32>, vector<8x8xf32>, vector<8x32xf32>, vector<8x8xf32> -> vector<8x56xf32>
    %c3_103 = arith.constant 3 : index
    %c0_104 = arith.constant 0 : index
    %c0_105 = arith.constant 0 : index
    %193 = vector.load %arg0[%c3_103, %c0_104, %c0_105] : memref<5x56x32xf32, #tpu.memory_space<vmem>>, vector<1x56x32xf32>
    %194 = vector.shape_cast %193 : vector<1x56x32xf32> to vector<56x32xf32>
    %cst_106 = arith.constant dense<0.000000e+00> : vector<8x32xf32>
    %195 = tpu.matmul %192, %194, %cst_106 {dimension_numbers = #tpu.dot_dimension_numbers<[1], [0], [0], [1], [0, 0, 1, 1], [], []>} : vector<8x56xf32>, vector<56x32xf32>, vector<8x32xf32> -> vector<8x32xf32>
    %196 = math.tanh %195 : vector<8x32xf32>
    %197 = tpu.concatenate %196, %10 in 1 : vector<8x32xf32>, vector<8x24xf32> -> vector<8x56xf32>
    %c4_107 = arith.constant 4 : index
    %c0_108 = arith.constant 0 : index
    %c0_109 = arith.constant 0 : index
    %198 = vector.load %arg0[%c4_107, %c0_108, %c0_109] : memref<5x56x32xf32, #tpu.memory_space<vmem>>, vector<1x56x32xf32>
    %199 = vector.shape_cast %198 : vector<1x56x32xf32> to vector<56x32xf32>
    %cst_110 = arith.constant dense<0.000000e+00> : vector<8x32xf32>
    %200 = tpu.matmul %197, %199, %cst_110 {dimension_numbers = #tpu.dot_dimension_numbers<[1], [0], [0], [1], [0, 0, 1, 1], [], []>} : vector<8x56xf32>, vector<56x32xf32>, vector<8x32xf32> -> vector<8x32xf32>
    %201 = vector.extract_strided_slice %200 {offsets = [0, 0], sizes = [8, 8], strides = [1, 1]} : vector<8x32xf32> to vector<8x8xf32>
    %202 = math.exp %201 : vector<8x8xf32>
    %203 = arith.mulf %202, %177 : vector<8x8xf32>
    %204 = arith.addf %203, %201 : vector<8x8xf32>
    %c6 = arith.constant 6 : index
    %c0_111 = arith.constant 0 : index
    %c0_112 = arith.constant 0 : index
    %205 = vector.load %arg1[%c6, %c0_111, %c0_112] : memref<8x8x24xf32, #tpu.memory_space<vmem>>, vector<1x8x24xf32>
    %206 = vector.shape_cast %205 : vector<1x8x24xf32> to vector<8x24xf32>
    %207 = vector.extract_strided_slice %206 {offsets = [0, 0], sizes = [8, 8], strides = [1, 1]} : vector<8x24xf32> to vector<8x8xf32>
    %208 = vector.extract_strided_slice %206 {offsets = [0, 8], sizes = [8, 8], strides = [1, 1]} : vector<8x24xf32> to vector<8x8xf32>
    %209 = vector.extract_strided_slice %206 {offsets = [0, 16], sizes = [8, 8], strides = [1, 1]} : vector<8x24xf32> to vector<8x8xf32>
    %210 = tpu.concatenate %191, %182, %11 in 1 : vector<8x8xf32>, vector<8x32xf32>, vector<8x16xf32> -> vector<8x56xf32>
    %c1_113 = arith.constant 1 : index
    %c0_114 = arith.constant 0 : index
    %c0_115 = arith.constant 0 : index
    %211 = vector.load %arg0[%c1_113, %c0_114, %c0_115] : memref<5x56x32xf32, #tpu.memory_space<vmem>>, vector<1x56x32xf32>
    %212 = vector.shape_cast %211 : vector<1x56x32xf32> to vector<56x32xf32>
    %cst_116 = arith.constant dense<0.000000e+00> : vector<8x32xf32>
    %213 = tpu.matmul %210, %212, %cst_116 {dimension_numbers = #tpu.dot_dimension_numbers<[1], [0], [0], [1], [0, 0, 1, 1], [], []>} : vector<8x56xf32>, vector<56x32xf32>, vector<8x32xf32> -> vector<8x32xf32>
    %214 = math.tanh %213 : vector<8x32xf32>
    %215 = tpu.concatenate %214, %10 in 1 : vector<8x32xf32>, vector<8x24xf32> -> vector<8x56xf32>
    %c2_117 = arith.constant 2 : index
    %c0_118 = arith.constant 0 : index
    %c0_119 = arith.constant 0 : index
    %216 = vector.load %arg0[%c2_117, %c0_118, %c0_119] : memref<5x56x32xf32, #tpu.memory_space<vmem>>, vector<1x56x32xf32>
    %217 = vector.shape_cast %216 : vector<1x56x32xf32> to vector<56x32xf32>
    %cst_120 = arith.constant dense<0.000000e+00> : vector<8x32xf32>
    %218 = tpu.matmul %215, %217, %cst_120 {dimension_numbers = #tpu.dot_dimension_numbers<[1], [0], [0], [1], [0, 0, 1, 1], [], []>} : vector<8x56xf32>, vector<56x32xf32>, vector<8x32xf32> -> vector<8x32xf32>
    %219 = vector.extract_strided_slice %218 {offsets = [0, 8], sizes = [8, 8], strides = [1, 1]} : vector<8x32xf32> to vector<8x8xf32>
    %220 = math.exp %219 : vector<8x8xf32>
    %221 = arith.mulf %220, %208 : vector<8x8xf32>
    %222 = vector.extract_strided_slice %218 {offsets = [0, 0], sizes = [8, 8], strides = [1, 1]} : vector<8x32xf32> to vector<8x8xf32>
    %223 = arith.addf %221, %222 : vector<8x8xf32>
    %224 = tpu.concatenate %223, %175, %196, %12 in 1 : vector<8x8xf32>, vector<8x8xf32>, vector<8x32xf32>, vector<8x8xf32> -> vector<8x56xf32>
    %c3_121 = arith.constant 3 : index
    %c0_122 = arith.constant 0 : index
    %c0_123 = arith.constant 0 : index
    %225 = vector.load %arg0[%c3_121, %c0_122, %c0_123] : memref<5x56x32xf32, #tpu.memory_space<vmem>>, vector<1x56x32xf32>
    %226 = vector.shape_cast %225 : vector<1x56x32xf32> to vector<56x32xf32>
    %cst_124 = arith.constant dense<0.000000e+00> : vector<8x32xf32>
    %227 = tpu.matmul %224, %226, %cst_124 {dimension_numbers = #tpu.dot_dimension_numbers<[1], [0], [0], [1], [0, 0, 1, 1], [], []>} : vector<8x56xf32>, vector<56x32xf32>, vector<8x32xf32> -> vector<8x32xf32>
    %228 = math.tanh %227 : vector<8x32xf32>
    %229 = tpu.concatenate %228, %10 in 1 : vector<8x32xf32>, vector<8x24xf32> -> vector<8x56xf32>
    %c4_125 = arith.constant 4 : index
    %c0_126 = arith.constant 0 : index
    %c0_127 = arith.constant 0 : index
    %230 = vector.load %arg0[%c4_125, %c0_126, %c0_127] : memref<5x56x32xf32, #tpu.memory_space<vmem>>, vector<1x56x32xf32>
    %231 = vector.shape_cast %230 : vector<1x56x32xf32> to vector<56x32xf32>
    %cst_128 = arith.constant dense<0.000000e+00> : vector<8x32xf32>
    %232 = tpu.matmul %229, %231, %cst_128 {dimension_numbers = #tpu.dot_dimension_numbers<[1], [0], [0], [1], [0, 0, 1, 1], [], []>} : vector<8x56xf32>, vector<56x32xf32>, vector<8x32xf32> -> vector<8x32xf32>
    %233 = vector.extract_strided_slice %232 {offsets = [0, 0], sizes = [8, 8], strides = [1, 1]} : vector<8x32xf32> to vector<8x8xf32>
    %234 = math.exp %233 : vector<8x8xf32>
    %235 = arith.mulf %234, %209 : vector<8x8xf32>
    %236 = arith.addf %235, %233 : vector<8x8xf32>
    %c7 = arith.constant 7 : index
    %c0_129 = arith.constant 0 : index
    %c0_130 = arith.constant 0 : index
    %237 = vector.load %arg1[%c7, %c0_129, %c0_130] : memref<8x8x24xf32, #tpu.memory_space<vmem>>, vector<1x8x24xf32>
    %238 = vector.shape_cast %237 : vector<1x8x24xf32> to vector<8x24xf32>
    %239 = vector.extract_strided_slice %238 {offsets = [0, 8], sizes = [8, 8], strides = [1, 1]} : vector<8x24xf32> to vector<8x8xf32>
    %240 = vector.extract_strided_slice %238 {offsets = [0, 16], sizes = [8, 8], strides = [1, 1]} : vector<8x24xf32> to vector<8x8xf32>
    %241 = tpu.concatenate %223, %214, %11 in 1 : vector<8x8xf32>, vector<8x32xf32>, vector<8x16xf32> -> vector<8x56xf32>
    %c1_131 = arith.constant 1 : index
    %c0_132 = arith.constant 0 : index
    %c0_133 = arith.constant 0 : index
    %242 = vector.load %arg0[%c1_131, %c0_132, %c0_133] : memref<5x56x32xf32, #tpu.memory_space<vmem>>, vector<1x56x32xf32>
    %243 = vector.shape_cast %242 : vector<1x56x32xf32> to vector<56x32xf32>
    %cst_134 = arith.constant dense<0.000000e+00> : vector<8x32xf32>
    %244 = tpu.matmul %241, %243, %cst_134 {dimension_numbers = #tpu.dot_dimension_numbers<[1], [0], [0], [1], [0, 0, 1, 1], [], []>} : vector<8x56xf32>, vector<56x32xf32>, vector<8x32xf32> -> vector<8x32xf32>
    %245 = math.tanh %244 : vector<8x32xf32>
    %246 = tpu.concatenate %245, %10 in 1 : vector<8x32xf32>, vector<8x24xf32> -> vector<8x56xf32>
    %c2_135 = arith.constant 2 : index
    %c0_136 = arith.constant 0 : index
    %c0_137 = arith.constant 0 : index
    %247 = vector.load %arg0[%c2_135, %c0_136, %c0_137] : memref<5x56x32xf32, #tpu.memory_space<vmem>>, vector<1x56x32xf32>
    %248 = vector.shape_cast %247 : vector<1x56x32xf32> to vector<56x32xf32>
    %cst_138 = arith.constant dense<0.000000e+00> : vector<8x32xf32>
    %249 = tpu.matmul %246, %248, %cst_138 {dimension_numbers = #tpu.dot_dimension_numbers<[1], [0], [0], [1], [0, 0, 1, 1], [], []>} : vector<8x56xf32>, vector<56x32xf32>, vector<8x32xf32> -> vector<8x32xf32>
    %250 = vector.extract_strided_slice %249 {offsets = [0, 8], sizes = [8, 8], strides = [1, 1]} : vector<8x32xf32> to vector<8x8xf32>
    %251 = math.exp %250 : vector<8x8xf32>
    %252 = arith.mulf %251, %239 : vector<8x8xf32>
    %253 = vector.extract_strided_slice %249 {offsets = [0, 0], sizes = [8, 8], strides = [1, 1]} : vector<8x32xf32> to vector<8x8xf32>
    %254 = arith.addf %252, %253 : vector<8x8xf32>
    %255 = tpu.concatenate %254, %207, %228, %12 in 1 : vector<8x8xf32>, vector<8x8xf32>, vector<8x32xf32>, vector<8x8xf32> -> vector<8x56xf32>
    %c3_139 = arith.constant 3 : index
    %c0_140 = arith.constant 0 : index
    %c0_141 = arith.constant 0 : index
    %256 = vector.load %arg0[%c3_139, %c0_140, %c0_141] : memref<5x56x32xf32, #tpu.memory_space<vmem>>, vector<1x56x32xf32>
    %257 = vector.shape_cast %256 : vector<1x56x32xf32> to vector<56x32xf32>
    %cst_142 = arith.constant dense<0.000000e+00> : vector<8x32xf32>
    %258 = tpu.matmul %255, %257, %cst_142 {dimension_numbers = #tpu.dot_dimension_numbers<[1], [0], [0], [1], [0, 0, 1, 1], [], []>} : vector<8x56xf32>, vector<56x32xf32>, vector<8x32xf32> -> vector<8x32xf32>
    %259 = math.tanh %258 : vector<8x32xf32>
    %260 = tpu.concatenate %259, %10 in 1 : vector<8x32xf32>, vector<8x24xf32> -> vector<8x56xf32>
    %c4_143 = arith.constant 4 : index
    %c0_144 = arith.constant 0 : index
    %c0_145 = arith.constant 0 : index
    %261 = vector.load %arg0[%c4_143, %c0_144, %c0_145] : memref<5x56x32xf32, #tpu.memory_space<vmem>>, vector<1x56x32xf32>
    %262 = vector.shape_cast %261 : vector<1x56x32xf32> to vector<56x32xf32>
    %cst_146 = arith.constant dense<0.000000e+00> : vector<8x32xf32>
    %263 = tpu.matmul %260, %262, %cst_146 {dimension_numbers = #tpu.dot_dimension_numbers<[1], [0], [0], [1], [0, 0, 1, 1], [], []>} : vector<8x56xf32>, vector<56x32xf32>, vector<8x32xf32> -> vector<8x32xf32>
    %264 = vector.extract_strided_slice %263 {offsets = [0, 0], sizes = [8, 8], strides = [1, 1]} : vector<8x32xf32> to vector<8x8xf32>
    %265 = math.exp %264 : vector<8x8xf32>
    %266 = arith.mulf %265, %240 : vector<8x8xf32>
    %267 = arith.addf %266, %264 : vector<8x8xf32>
    %268 = tpu.concatenate %44, %76, %108, %140, %172, %204, %236, %267 in 1 : vector<8x8xf32>, vector<8x8xf32>, vector<8x8xf32>, vector<8x8xf32>, vector<8x8xf32>, vector<8x8xf32>, vector<8x8xf32>, vector<8x8xf32> -> vector<8x64xf32>
    %c0_147 = arith.constant 0 : index
    %c0_148 = arith.constant 0 : index
    %269 = vector.load %arg3[%c0_147, %c0_148] : memref<8x64xf32, #tpu.memory_space<vmem>>, vector<8x64xf32>
    tpu.vector_store %arg3[%c0_147, %c0_148], %268 {strides = array<i32>} : memref<8x64xf32, #tpu.memory_space<vmem>>, vector<8x64xf32>,
    return
  }
}

</mosaic_0001>

<bundles_post_ra>
// kernel: tpu_custom_call.1
= control target key start
LH: loop header
LB: loop body
LE: loop exit
PB: predicated region body
PF: predicated region fallthrough
CT: control target
= control target key end

     0   :  { %v16_v1 = vlaneseq  ;;  %s4051_s16 = smov 32   ;;  %v4052_v3 = vmov 0.0|0.0   ;;  %vm4053_vm0 = vmmov 0   ;;  %v4054_v9 = vmov 0.0   ;;  %s4831_s0 = inlined_call_operand.vmem [shape: f32[5,56,32], index: 0, kind: input, shape index: {}]   ;;  %s4832_s1 = inlined_call_operand.vmem [shape: f32[8,8,24], index: 1, kind: input, shape index: {}]   ;;  %s4833_s2 = inlined_call_operand.vmem [shape: f32[8,112], index: 2, kind: input, shape index: {}]   ;;  %s4834_s3 = inlined_call_operand.hbm [shape: f32[8,64], index: 3, kind: output, shape index: {}]  }
   0x1   :  { %v4089_v0 = vld [vmem:[%s4833_s2] sm:$0xff]  ;;  %v2790_v2 = vld [vmem:[%s4831_s0 + $0x38] sm:$0xff]  ;;  %3657 = vmatprep.subr.bf16.mxu0 %v4052_v3  ;;  %v2792_v5 = vld [vmem:[%s4831_s0 + $0x48] sm:$0xff]  ;;  %3127 = vmatprep.mubr.msk.f32.mxu0 %vm4053_vm0, %v4054_v9 }
   0x2   :  { %22 = vrot.lane.b32.xlu0 %v4089_v0, %s4051_s16  ;;  %v2791_v4 = vld [vmem:[%s4831_s0 + $0x40] sm:$0xff]  ;;  %v2793_v6 = vld [vmem:[%s4831_s0 + $0x50] sm:$0xff]  ;;  %v17_v7 = vand.u32 127, %v16_v1  ;;  %3666 = vmatprep.subr.bf16.mxu1 %v4052_v3 }
   0x3   :  { %v4106_v8 = vpack.c.bf16 %v2791_v4, %v2790_v2  ;;  %3144 = vmatprep.mubr.msk.f32.mxu1 %vm4053_vm0, %v4054_v9 }
   0x4   :  { %8 = vsyncpa [#allocation3], 0  ;;  %vm18_vm1 = vcmp.eq.s32.totalorder %v17_v7, 0  ;;  %v4114_v10 = vpack.c.bf16 %v2793_v6, %v2792_v5  ;;  %s4055_s22 = smov 104   ;;  %v2794_v12 = vld [vmem:[%s4831_s0 + $0x58] sm:$0xff]  ;;  %v2795_v13 = vld [vmem:[%s4831_s0 + $0x60] sm:$0xff] }
   0x5   :  { %3659 = vmatpush3.bf16.msra.mxu0 %v4106_v8  ;;  %v4118_v11 = vsel %vm18_vm1, 1.0, %v4054_v9  ;;  %s4056_s27 = smov 40   ;;  %v4130_v14 = vpack.c.bf16 %v2795_v13, %v2794_v12  ;;  %v4140_v15 = vld [vmem:[%s4831_s0 + $0x68] sm:$0xff]  ;;  %vm32_vm2 = vcmask 64512   ;;  %vm34_vm3 = vcmask 326656   ;;  %v2798_v21 = vld [vmem:[%s4831_s0 + $0x70] sm:$0xff] }
   0x6   :  { %25 = vrot.lane.b32.xlu0 %v4089_v0, %s4055_s22  ;;  %3660 = vmatprep.subr.bf16.mxu0 %v4052_v3  ;;  %vm44_vm4 = vcmask 457728   ;;  %v2799_v22 = vld [vmem:[%s4831_s0 + $0x78] sm:$0xff]  ;;  %v2800_v24 = vld [vmem:[%s4831_s0 + $0x80] sm:$0xff]  ;;  %v2801_v25 = vld [vmem:[%s4831_s0 + $0x88] sm:$0xff]  ;;  %vm122_vm5 = vcmask 261120   ;;  %s4057_s30 = smov 8  }
   0x7   :  { %29 = vrot.lane.b32.xlu1 %v4118_v11, %s4056_s27  ;;  %v4161_v23 = vpack.c.bf16 %v2799_v22, %v2798_v21  ;;  %v2802_v26 = vld [vmem:[%s4831_s0 + $0x90] sm:$0xff]  ;;  %v4174_v27 = vpack.c.bf16 %v2801_v25, %v2800_v24  ;;  %v2803_v28 = vld [vmem:[%s4831_s0 + $0x98] sm:$0xff]  ;;  %v4188_v30 = vld [vmem:[%s4831_s0 + $0xa0] sm:$0xff]  ;;  %s4058_s4 = smov 80   ;;  %s4059_s9 = smov 120   ;;  %vm224_vm6 = vcmask 130048  }
   0x8   :  { %v4180_v29 = vpack.c.bf16 %v2803_v28, %v2802_v26  ;;  %v2806_v36 = vld [vmem:[%s4831_s0 + $0xa8] sm:$0xff]  ;;  %v2807_v37 = vld [vmem:[%s4831_s0 + $0xb0] sm:$0xff]  ;;  %v2808_v38 = vld [vmem:[%s4831_s0 + $0xb8] sm:$0xff]  ;;  %s4060_s10 = smov 48   ;;  %vm226_vm7 = vcmask 392192   ;;  %s4061_s28 = smov 16  }
   0x9   :  { %3662 = vmatpush3.bf16.msra.mxu0 %v4114_v10  ;;  %3668 = vmatpush3.bf16.msra.mxu1 %v4161_v23  ;;  %v4208_v39 = vpack.c.bf16 %v2807_v37, %v2806_v36  ;;  %v2809_v40 = vld [vmem:[%s4831_s0 + $0xc0] sm:$0xff]  ;;  %v2810_v42 = vld [vmem:[%s4831_s0 + $0xc8] sm:$0xff]  ;;  %v2811_v43 = vld [vmem:[%s4831_s0 + $0xd0] sm:$0xff]  ;;  %vm2768_vm8 = vcmask 195584   ;;  %vm2774_vm9 = vcmask 523264  }
   0xa   :  { %3663 = vmatprep.subr.bf16.mxu0 %v4052_v3  ;;  %3669 = vmatprep.subr.bf16.mxu1 %v4052_v3  ;;  %v4214_v41 = vpack.c.bf16 %v2809_v40, %v2808_v38  ;;  %v4225_v46 = vpack.c.bf16 %v2811_v43, %v2810_v42  ;;  %v4235_v48 = vld [vmem:[%s4831_s0 + $0xd8] sm:$0xff]  ;;  %v4242_v50 = vld [vmem:[%s4832_s1] sm:$0xff]  ;;  %v2815_v55 = vld [vmem:[%s4831_s0 + $0xe8] sm:$0xff] }
   0xb   :  { %119 = vrot.lane.b32.xlu1 %v4118_v11, %s4051_s16  ;;  %v2814_v54 = vld [vmem:[%s4831_s0 + $0xe0] sm:$0xff]  ;;  %v2816_v2 = vld [vmem:[%s4831_s0 + $0xf0] sm:$0xff]  ;;  %v2817_v4 = vld [vmem:[%s4831_s0 + $0xf8] sm:$0xff] }
   0xc   :  { %v4254_v56 = vpack.c.bf16 %v2815_v55, %v2814_v54  ;;  %v2818_v5 = vld [vmem:[%s4831_s0 + $0x100] sm:$0xff]  ;;  %v4299_v6 = vpack.c.bf16 %v2817_v4, %v2816_v2  ;;  %v2819_v7 = vld [vmem:[%s4831_s0 + $0x108] sm:$0xff]  ;;  %v4313_v12 = vld [vmem:[%s4831_s0 + $0x110] sm:$0xff] }
   0xd   :  { %3665 = vmatpush3.bf16.msra.mxu0 %v4130_v14  ;;  %3671 = vmatpush3.bf16.msra.mxu1 %v4174_v27 }
   0xe   :  { %3125 = vmatprep.subr.mxu0 %v4054_v9  ;;  %3672 = vmatprep.subr.bf16.mxu1 %v4052_v3 }
  0x11   :  { %3126 = vmatpush3.msra.mxu0 %v4140_v15  ;;  %3674 = vmatpush3.bf16.msra.mxu1 %v4180_v29 }
  0x12   :  { %3675 = vmatprep.subr.bf16.mxu0 %v4052_v3  ;;  %3142 = vmatprep.subr.mxu1 %v4054_v9 }
  0x15   :  { %3143 = vmatpush3.msra.mxu1 %v4188_v30 }
  0x16   :  { %3684 = vmatprep.subr.bf16.mxu1 %v4052_v3 }
  0x74   :  { %v4144_v16 = vpop.permute.xlu0 %22 }
  0x78   :  { %v26_v17 = vpop.permute.xlu0 %25 }
  0x79   :  { %v33_v18 = vsel %vm32_vm2, %v4144_v16, %v26_v17  ;;  %v4148_v19 = vpop.permute.xlu1 %29 }
  0x7a   :  { %v35_v20 = vsel %vm34_vm3, %v33_v18, %v4148_v19 }
  0x7b   :  { %3128 = vmatmul.mubr.msk.f32.vlgmr.msra.gmra.mrb[0].mxu0 %vm44_vm4, %v35_v20 }
  0x7c   :  { %3161 = vmatprep.mubr.msk.f32.mxu0 %vm4053_vm0, %v4054_v9  ;;  %3677 = vmatpush3.bf16.msra.mxu0 %v4208_v39 }
  0x7d   :  { %v4192_v33 = vpop.permute.xlu1 %119  ;;  %3678 = vmatprep.subr.bf16.mxu0 %v4052_v3 }
  0x80   :  { %3680 = vmatpush3.bf16.msra.mxu0 %v4214_v41 }
  0x81   :  { %3681 = vmatprep.subr.bf16.mxu0 %v4052_v3 }
  0x84   :  { %3683 = vmatpush3.bf16.msra.mxu0 %v4225_v46 }
  0x85   :  { %3159 = vmatprep.subr.mxu0 %v4054_v9 }
  0x88   :  { %3160 = vmatpush3.msra.mxu0 %v4235_v48 }
  0x89   :  { %3693 = vmatprep.subr.bf16.mxu0 %v4052_v3 }
 0x14e   :  { %v114_v31 = vpop.f32.mrb[0].mxu0 }
 0x14f   :  { %3960 = vtanh.f32 %v114_v31  ;;  %v3129_v32 = vpop.f32.mrb[1].mxu0 }
 0x159   :  { %v3961_v34 = vpop.eup %3960 }
 0x15a   :  { %v123_v35 = vsel %vm122_vm5, %v3961_v34, %v4192_v33 }
 0x15b   :  { %3145 = vmatmul.mubr.msk.f32.vlgmr.msra.gmra.mrb[0].mxu1 %vm44_vm4, %v123_v35  ;;  %v4352_v35 = vld [vmem:[%s4832_s1 + $0x8] sm:$0xff] }
 0x15c   :  { %3178 = vmatprep.mubr.msk.f32.mxu1 %vm4053_vm0, %v4054_v9  ;;  %3686 = vmatpush3.bf16.msra.mxu1 %v4254_v56 }
 0x15d   :  { %3687 = vmatprep.subr.bf16.mxu1 %v4052_v3 }
 0x160   :  { %3689 = vmatpush3.bf16.msra.mxu1 %v4299_v6 }
 0x161   :  { %3690 = vmatprep.subr.bf16.mxu1 %v4052_v3 }
 0x22e   :  { %v201_v44 = vpop.f32.mrb[0].mxu1 }
 0x22f   :  { %209 = vrot.lane.b32.xlu0 %v201_v44, %s4057_s30  ;;  %v3146_v45 = vpop.f32.mrb[1].mxu1  ;;  %v205_v47 = vmul.f32 1.442695, %v201_v44 }
 0x231   :  { %3962 = vpow2.f32 %v205_v47 }
 0x233   :  { %217 = vrot.lane.b32.xlu0 %v4089_v0, %s4058_s4 }
 0x237   :  { %403 = vrot.lane.b32.xlu0 %v3961_v34, %s4057_s30 }
 0x23b   :  { %v3963_v49 = vpop.eup %3962 }
 0x23c   :  { %v207_v51 = vmul.f32 %v3963_v49, %v4242_v50 }
 0x2a1   :  { %v210_v52 = vpop.permute.xlu0 %209 }
 0x2a2   :  { %v212_v53 = vadd.f32 %v210_v52, %v207_v51 }
 0x2a4   :  { %214 = vrot.lane.b32.xlu1 %v212_v53, %s4059_s9 }
 0x2a5   :  { %v218_v59 = vpop.permute.xlu0 %217 }
 0x2a8   :  { %220 = vrot.lane.b32.xlu1 %v4118_v11, %s4060_s10  ;;  %v4305_v11 = vpack.c.bf16 %v2819_v7, %v2818_v5  ;;  %v4421_v5 = vld [vmem:[%s4832_s1 + $0x10] sm:$0xff] }
 0x2a9   :  { %v404_v63 = vpop.permute.xlu0 %403 }
 0x2aa   :  { %3692 = vmatpush3.bf16.msra.mxu1 %v4305_v11 }
 0x2ab   :  { %3176 = vmatprep.subr.mxu1 %v4054_v9 }
 0x2ae   :  { %3177 = vmatpush3.msra.mxu1 %v4313_v12 }
 0x2af   :  { %3702 = vmatprep.subr.bf16.mxu1 %v4052_v3 }
 0x316   :  { %v215_v57 = vpop.permute.xlu1 %214 }
 0x317   :  { %v223_v58 = vsel %vm32_vm2, %v215_v57, %v4144_v16  ;;  %v406_v0 = vsel %vm32_vm2, %v215_v57, %v404_v63 }
 0x318   :  { %v225_v60 = vsel %vm224_vm6, %v223_v58, %v218_v59  ;;  %v407_v1 = vsel %vm34_vm3, %v406_v0, %v4148_v19 }
 0x31a   :  { %v4261_v61 = vpop.permute.xlu1 %220 }
 0x31b   :  { %v227_v62 = vsel %vm226_vm7, %v225_v60, %v4261_v61 }
 0x31c   :  { %3162 = vmatmul.mubr.msk.f32.vlgmr.msra.gmra.mrb[2].mxu0 %vm44_vm4, %v227_v62 }
 0x31d   :  { %3695 = vmatpush3.bf16.msra.mxu0 %v4106_v8  ;;  %3195 = vmatprep.mubr.msk.f32.mxu0 %vm4053_vm0, %v4054_v9 }
 0x31e   :  { %3696 = vmatprep.subr.bf16.mxu0 %v4052_v3 }
 0x321   :  { %3698 = vmatpush3.bf16.msra.mxu0 %v4114_v10 }
 0x322   :  { %3699 = vmatprep.subr.bf16.mxu0 %v4052_v3 }
 0x325   :  { %3701 = vmatpush3.bf16.msra.mxu0 %v4130_v14 }
 0x326   :  { %3193 = vmatprep.subr.mxu0 %v4054_v9 }
 0x329   :  { %3194 = vmatpush3.msra.mxu0 %v4140_v15 }
 0x32a   :  { %3196 = vmatmul.mubr.msk.f32.vlgmr.msra.gmra.mrb[4].mxu0 %vm44_vm4, %v407_v1  ;;  %3711 = vmatprep.subr.bf16.mxu0 %v4052_v3 }
 0x32b   :  { %3713 = vmatpush3.bf16.msra.mxu0 %v4208_v39  ;;  %3229 = vmatprep.mubr.msk.f32.mxu0 %vm4053_vm0, %v4054_v9 }
 0x32c   :  { %3714 = vmatprep.subr.bf16.mxu0 %v4052_v3 }
 0x32f   :  { %3716 = vmatpush3.bf16.msra.mxu0 %v4214_v41 }
 0x330   :  { %3717 = vmatprep.subr.bf16.mxu0 %v4052_v3 }
 0x333   :  { %3719 = vmatpush3.bf16.msra.mxu0 %v4225_v46 }
 0x334   :  { %3227 = vmatprep.subr.mxu0 %v4054_v9 }
 0x337   :  { %3228 = vmatpush3.msra.mxu0 %v4235_v48 }
 0x338   :  { %3729 = vmatprep.subr.bf16.mxu0 %v4052_v3 }
 0x3ef   :  { %v305_v13 = vpop.f32.mrb[2].mxu0 }
 0x3f0   :  { %3964 = vtanh.f32 %v305_v13  ;;  %v3163_v16 = vpop.f32.mrb[3].mxu0 }
 0x3fa   :  { %v3965_v17 = vpop.eup %3964 }
 0x3fb   :  { %v310_v18 = vsel %vm122_vm5, %v3965_v17, %v4192_v33 }
 0x3fc   :  { %3179 = vmatmul.mubr.msk.f32.vlgmr.msra.gmra.mrb[2].mxu1 %vm44_vm4, %v310_v18 }
 0x3fd   :  { %v477_v20 = vpop.f32.mrb[4].mxu0  ;;  %3704 = vmatpush3.bf16.msra.mxu1 %v4161_v23  ;;  %3212 = vmatprep.mubr.msk.f32.mxu1 %vm4053_vm0, %v4054_v9 }
 0x3fe   :  { %3966 = vtanh.f32 %v477_v20  ;;  %v3197_v21 = vpop.f32.mrb[5].mxu0  ;;  %3705 = vmatprep.subr.bf16.mxu1 %v4052_v3 }
 0x401   :  { %3707 = vmatpush3.bf16.msra.mxu1 %v4174_v27 }
 0x402   :  { %3708 = vmatprep.subr.bf16.mxu1 %v4052_v3 }
 0x405   :  { %3710 = vmatpush3.bf16.msra.mxu1 %v4180_v29 }
 0x406   :  { %3210 = vmatprep.subr.mxu1 %v4054_v9 }
 0x408   :  { %v3967_v22 = vpop.eup %3966 }
 0x409   :  { %3211 = vmatpush3.msra.mxu1 %v4188_v30  ;;  %v482_v24 = vsel %vm122_vm5, %v3967_v22, %v4192_v33 }
 0x40a   :  { %3213 = vmatmul.mubr.msk.f32.vlgmr.msra.gmra.mrb[4].mxu1 %vm44_vm4, %v482_v24  ;;  %3720 = vmatprep.subr.bf16.mxu1 %v4052_v3 }
 0x40b   :  { %3722 = vmatpush3.bf16.msra.mxu1 %v4254_v56  ;;  %3246 = vmatprep.mubr.msk.f32.mxu1 %vm4053_vm0, %v4054_v9 }
 0x40c   :  { %3723 = vmatprep.subr.bf16.mxu1 %v4052_v3 }
 0x40f   :  { %3725 = vmatpush3.bf16.msra.mxu1 %v4299_v6 }
 0x410   :  { %3726 = vmatprep.subr.bf16.mxu1 %v4052_v3 }
 0x413   :  { %3728 = vmatpush3.bf16.msra.mxu1 %v4305_v11 }
 0x414   :  { %3244 = vmatprep.subr.mxu1 %v4054_v9 }
 0x417   :  { %3245 = vmatpush3.msra.mxu1 %v4313_v12 }
 0x418   :  { %3738 = vmatprep.subr.bf16.mxu1 %v4052_v3 }
 0x4cf   :  { %v4343_v25 = vpop.f32.mrb[2].mxu1 }
 0x4d0   :  { %v3180_v26 = vpop.f32.mrb[3].mxu1 }
 0x4dd   :  { %v552_v28 = vpop.f32.mrb[4].mxu1 }
 0x4de   :  { %560 = vrot.lane.b32.xlu1 %v552_v28, %s4057_s30  ;;  %v3214_v31 = vpop.f32.mrb[5].mxu1  ;;  %v556_v32 = vmul.f32 1.442695, %v552_v28 }
 0x4e0   :  { %3968 = vpow2.f32 %v556_v32 }
 0x4e2   :  { %568 = vrot.lane.b32.xlu1 %v4242_v50, %s4057_s30 }
 0x4e6   :  { %737 = vrot.lane.b32.xlu1 %v3967_v22, %s4057_s30 }
 0x4ea   :  { %v3969_v34 = vpop.eup %3968 }
 0x4eb   :  { %v558_v36 = vmul.f32 %v3969_v34, %v4352_v35 }
 0x550   :  { %v561_v37 = vpop.permute.xlu1 %560 }
 0x551   :  { %v563_v38 = vadd.f32 %v561_v37, %v558_v36 }
 0x553   :  { %565 = vrot.lane.b32.xlu0 %v563_v38, %s4059_s9 }
 0x554   :  { %v569_v42 = vpop.permute.xlu1 %568 }
 0x557   :  { %572 = vrot.lane.b32.xlu0 %v3965_v17, %s4061_s28 }
 0x558   :  { %v738_v49 = vpop.permute.xlu1 %737 }
 0x5c5   :  { %v566_v40 = vpop.permute.xlu0 %565 }
 0x5c6   :  { %v575_v43 = vsel %vm32_vm2, %v566_v40, %v569_v42  ;;  %v740_v50 = vsel %vm32_vm2, %v566_v40, %v738_v49 }
 0x5c7   :  { %v741_v51 = vsel %vm34_vm3, %v740_v50, %v4148_v19 }
 0x5c9   :  { %v573_v44 = vpop.permute.xlu0 %572 }
 0x5ca   :  { %v576_v45 = vsel %vm224_vm6, %v575_v43, %v573_v44 }
 0x5cb   :  { %v577_v47 = vsel %vm226_vm7, %v576_v45, %v4261_v61 }
 0x5cc   :  { %3230 = vmatmul.mubr.msk.f32.vlgmr.msra.gmra.mrb[6].mxu0 %vm44_vm4, %v577_v47 }
 0x5cd   :  { %3731 = vmatpush3.bf16.msra.mxu0 %v4106_v8  ;;  %3263 = vmatprep.mubr.msk.f32.mxu0 %vm4053_vm0, %v4054_v9 }
 0x5ce   :  { %3732 = vmatprep.subr.bf16.mxu0 %v4052_v3 }
 0x5d1   :  { %3734 = vmatpush3.bf16.msra.mxu0 %v4114_v10 }
 0x5d2   :  { %3735 = vmatprep.subr.bf16.mxu0 %v4052_v3 }
 0x5d5   :  { %3737 = vmatpush3.bf16.msra.mxu0 %v4130_v14 }
 0x5d6   :  { %3261 = vmatprep.subr.mxu0 %v4054_v9 }
 0x5d9   :  { %3262 = vmatpush3.msra.mxu0 %v4140_v15 }
 0x5da   :  { %3264 = vmatmul.mubr.msk.f32.vlgmr.msra.gmra.mrb[8].mxu0 %vm44_vm4, %v741_v51  ;;  %3747 = vmatprep.subr.bf16.mxu0 %v4052_v3 }
 0x5db   :  { %3749 = vmatpush3.bf16.msra.mxu0 %v4208_v39  ;;  %3297 = vmatprep.mubr.msk.f32.mxu0 %vm4053_vm0, %v4054_v9 }
 0x5dc   :  { %3750 = vmatprep.subr.bf16.mxu0 %v4052_v3 }
 0x5df   :  { %3752 = vmatpush3.bf16.msra.mxu0 %v4214_v41 }
 0x5e0   :  { %3753 = vmatprep.subr.bf16.mxu0 %v4052_v3 }
 0x5e3   :  { %3755 = vmatpush3.bf16.msra.mxu0 %v4225_v46 }
 0x5e4   :  { %3295 = vmatprep.subr.mxu0 %v4054_v9 }
 0x5e7   :  { %3296 = vmatpush3.msra.mxu0 %v4235_v48 }
 0x5e8   :  { %3765 = vmatprep.subr.bf16.mxu0 %v4052_v3 }
 0x69f   :  { %v647_v52 = vpop.f32.mrb[6].mxu0 }
 0x6a0   :  { %3970 = vtanh.f32 %v647_v52  ;;  %v3231_v53 = vpop.f32.mrb[7].mxu0  ;;  %v4490_v52 = vld [vmem:[%s4832_s1 + $0x18] sm:$0xff] }
 0x6aa   :  { %v3971_v54 = vpop.eup %3970 }
 0x6ab   :  { %v652_v55 = vsel %vm122_vm5, %v3971_v54, %v4192_v33 }
 0x6ac   :  { %3247 = vmatmul.mubr.msk.f32.vlgmr.msra.gmra.mrb[6].mxu1 %vm44_vm4, %v652_v55 }
 0x6ad   :  { %v811_v57 = vpop.f32.mrb[8].mxu0  ;;  %3740 = vmatpush3.bf16.msra.mxu1 %v4161_v23  ;;  %3280 = vmatprep.mubr.msk.f32.mxu1 %vm4053_vm0, %v4054_v9 }
 0x6ae   :  { %3972 = vtanh.f32 %v811_v57  ;;  %v3265_v58 = vpop.f32.mrb[9].mxu0  ;;  %3741 = vmatprep.subr.bf16.mxu1 %v4052_v3 }
 0x6b1   :  { %3743 = vmatpush3.bf16.msra.mxu1 %v4174_v27 }
 0x6b2   :  { %3744 = vmatprep.subr.bf16.mxu1 %v4052_v3 }
 0x6b5   :  { %3746 = vmatpush3.bf16.msra.mxu1 %v4180_v29 }
 0x6b6   :  { %3278 = vmatprep.subr.mxu1 %v4054_v9 }
 0x6b8   :  { %v3973_v59 = vpop.eup %3972 }
 0x6b9   :  { %3279 = vmatpush3.msra.mxu1 %v4188_v30  ;;  %v816_v60 = vsel %vm122_vm5, %v3973_v59, %v4192_v33 }
 0x6ba   :  { %3281 = vmatmul.mubr.msk.f32.vlgmr.msra.gmra.mrb[8].mxu1 %vm44_vm4, %v816_v60  ;;  %3756 = vmatprep.subr.bf16.mxu1 %v4052_v3 }
 0x6bb   :  { %3758 = vmatpush3.bf16.msra.mxu1 %v4254_v56  ;;  %3314 = vmatprep.mubr.msk.f32.mxu1 %vm4053_vm0, %v4054_v9 }
 0x6bc   :  { %3759 = vmatprep.subr.bf16.mxu1 %v4052_v3 }
 0x6bf   :  { %3761 = vmatpush3.bf16.msra.mxu1 %v4299_v6 }
 0x6c0   :  { %3762 = vmatprep.subr.bf16.mxu1 %v4052_v3 }
 0x6c3   :  { %3764 = vmatpush3.bf16.msra.mxu1 %v4305_v11 }
 0x6c4   :  { %3312 = vmatprep.subr.mxu1 %v4054_v9 }
 0x6c7   :  { %3313 = vmatpush3.msra.mxu1 %v4313_v12 }
 0x6c8   :  { %3774 = vmatprep.subr.bf16.mxu1 %v4052_v3 }
 0x77f   :  { %v4412_v62 = vpop.f32.mrb[6].mxu1 }
 0x780   :  { %v3248_v63 = vpop.f32.mrb[7].mxu1 }
 0x78d   :  { %v886_v0 = vpop.f32.mrb[8].mxu1 }
 0x78e   :  { %894 = vrot.lane.b32.xlu0 %v886_v0, %s4057_s30  ;;  %v3282_v1 = vpop.f32.mrb[9].mxu1  ;;  %v890_v2 = vmul.f32 1.442695, %v886_v0 }
 0x790   :  { %3974 = vpow2.f32 %v890_v2 }
 0x792   :  { %902 = vrot.lane.b32.xlu0 %v4352_v35, %s4057_s30 }
 0x796   :  { %1071 = vrot.lane.b32.xlu0 %v3973_v59, %s4057_s30 }
 0x79a   :  { %v3975_v4 = vpop.eup %3974 }
 0x79b   :  { %v892_v7 = vmul.f32 %v3975_v4, %v4421_v5 }
 0x800   :  { %v895_v13 = vpop.permute.xlu0 %894 }
 0x801   :  { %v897_v16 = vadd.f32 %v895_v13, %v892_v7 }
 0x803   :  { %899 = vrot.lane.b32.xlu1 %v897_v16, %s4059_s9 }
 0x804   :  { %v903_v18 = vpop.permute.xlu0 %902 }
 0x807   :  { %906 = vrot.lane.b32.xlu1 %v3971_v54, %s4061_s28 }
 0x808   :  { %v1072_v26 = vpop.permute.xlu0 %1071 }
 0x875   :  { %v900_v17 = vpop.permute.xlu1 %899 }
 0x876   :  { %v909_v20 = vsel %vm32_vm2, %v900_v17, %v903_v18  ;;  %v1074_v28 = vsel %vm32_vm2, %v900_v17, %v1072_v26 }
 0x877   :  { %v1075_v31 = vsel %vm34_vm3, %v1074_v28, %v4148_v19 }
 0x879   :  { %v907_v21 = vpop.permute.xlu1 %906 }
 0x87a   :  { %v910_v22 = vsel %vm224_vm6, %v909_v20, %v907_v21 }
 0x87b   :  { %v911_v24 = vsel %vm226_vm7, %v910_v22, %v4261_v61 }
 0x87c   :  { %3298 = vmatmul.mubr.msk.f32.vlgmr.msra.gmra.mrb[10].mxu0 %vm44_vm4, %v911_v24 }
 0x87d   :  { %3767 = vmatpush3.bf16.msra.mxu0 %v4106_v8  ;;  %3331 = vmatprep.mubr.msk.f32.mxu0 %vm4053_vm0, %v4054_v9 }
 0x87e   :  { %3768 = vmatprep.subr.bf16.mxu0 %v4052_v3 }
 0x881   :  { %3770 = vmatpush3.bf16.msra.mxu0 %v4114_v10 }
 0x882   :  { %3771 = vmatprep.subr.bf16.mxu0 %v4052_v3 }
 0x885   :  { %3773 = vmatpush3.bf16.msra.mxu0 %v4130_v14 }
 0x886   :  { %3329 = vmatprep.subr.mxu0 %v4054_v9 }
 0x889   :  { %3330 = vmatpush3.msra.mxu0 %v4140_v15 }
 0x88a   :  { %3332 = vmatmul.mubr.msk.f32.vlgmr.msra.gmra.mrb[12].mxu0 %vm44_vm4, %v1075_v31  ;;  %3783 = vmatprep.subr.bf16.mxu0 %v4052_v3 }
 0x88b   :  { %3785 = vmatpush3.bf16.msra.mxu0 %v4208_v39  ;;  %3365 = vmatprep.mubr.msk.f32.mxu0 %vm4053_vm0, %v4054_v9 }
 0x88c   :  { %3786 = vmatprep.subr.bf16.mxu0 %v4052_v3 }
 0x88f   :  { %3788 = vmatpush3.bf16.msra.mxu0 %v4214_v41 }
 0x890   :  { %3789 = vmatprep.subr.bf16.mxu0 %v4052_v3 }
 0x893   :  { %3791 = vmatpush3.bf16.msra.mxu0 %v4225_v46 }
 0x894   :  { %3363 = vmatprep.subr.mxu0 %v4054_v9 }
 0x897   :  { %3364 = vmatpush3.msra.mxu0 %v4235_v48 }
 0x898   :  { %3801 = vmatprep.subr.bf16.mxu0 %v4052_v3 }
 0x94f   :  { %v981_v32 = vpop.f32.mrb[10].mxu0 }
 0x950   :  { %3976 = vtanh.f32 %v981_v32  ;;  %v3299_v34 = vpop.f32.mrb[11].mxu0 }
 0x95a   :  { %v3977_v36 = vpop.eup %3976 }
 0x95b   :  { %v986_v37 = vsel %vm122_vm5, %v3977_v36, %v4192_v33 }
 0x95c   :  { %3315 = vmatmul.mubr.msk.f32.vlgmr.msra.gmra.mrb[10].mxu1 %vm44_vm4, %v986_v37 }
 0x95d   :  { %v1145_v38 = vpop.f32.mrb[12].mxu0  ;;  %3776 = vmatpush3.bf16.msra.mxu1 %v4161_v23  ;;  %3348 = vmatprep.mubr.msk.f32.mxu1 %vm4053_vm0, %v4054_v9 }
 0x95e   :  { %3978 = vtanh.f32 %v1145_v38  ;;  %v3333_v40 = vpop.f32.mrb[13].mxu0  ;;  %3777 = vmatprep.subr.bf16.mxu1 %v4052_v3 }
 0x961   :  { %3779 = vmatpush3.bf16.msra.mxu1 %v4174_v27 }
 0x962   :  { %3780 = vmatprep.subr.bf16.mxu1 %v4052_v3 }
 0x965   :  { %3782 = vmatpush3.bf16.msra.mxu1 %v4180_v29 }
 0x966   :  { %3346 = vmatprep.subr.mxu1 %v4054_v9 }
 0x968   :  { %v3979_v42 = vpop.eup %3978 }
 0x969   :  { %3347 = vmatpush3.msra.mxu1 %v4188_v30  ;;  %v1150_v43 = vsel %vm122_vm5, %v3979_v42, %v4192_v33 }
 0x96a   :  { %3349 = vmatmul.mubr.msk.f32.vlgmr.msra.gmra.mrb[12].mxu1 %vm44_vm4, %v1150_v43  ;;  %3792 = vmatprep.subr.bf16.mxu1 %v4052_v3 }
 0x96b   :  { %3794 = vmatpush3.bf16.msra.mxu1 %v4254_v56  ;;  %3382 = vmatprep.mubr.msk.f32.mxu1 %vm4053_vm0, %v4054_v9 }
 0x96c   :  { %3795 = vmatprep.subr.bf16.mxu1 %v4052_v3 }
 0x96f   :  { %3797 = vmatpush3.bf16.msra.mxu1 %v4299_v6 }
 0x970   :  { %3798 = vmatprep.subr.bf16.mxu1 %v4052_v3 }
 0x973   :  { %3800 = vmatpush3.bf16.msra.mxu1 %v4305_v11 }
 0x974   :  { %3380 = vmatprep.subr.mxu1 %v4054_v9 }
 0x977   :  { %3381 = vmatpush3.msra.mxu1 %v4313_v12 }
 0x978   :  { %3810 = vmatprep.subr.bf16.mxu1 %v4052_v3 }
 0xa2f   :  { %v4481_v44 = vpop.f32.mrb[10].mxu1 }
 0xa30   :  { %v3316_v45 = vpop.f32.mrb[11].mxu1 }
 0xa3d   :  { %v1220_v47 = vpop.f32.mrb[12].mxu1 }
 0xa3e   :  { %1228 = vrot.lane.b32.xlu1 %v1220_v47, %s4057_s30  ;;  %v3350_v49 = vpop.f32.mrb[13].mxu1  ;;  %v1224_v50 = vmul.f32 1.442695, %v1220_v47 }
 0xa40   :  { %3980 = vpow2.f32 %v1224_v50 }
 0xa42   :  { %1236 = vrot.lane.b32.xlu1 %v4421_v5, %s4057_s30 }
 0xa46   :  { %1405 = vrot.lane.b32.xlu1 %v3979_v42, %s4057_s30 }
 0xa4a   :  { %v3981_v51 = vpop.eup %3980 }
 0xa4b   :  { %v1226_v53 = vmul.f32 %v3981_v51, %v4490_v52 }
 0xab0   :  { %v1229_v54 = vpop.permute.xlu1 %1228 }
 0xab1   :  { %v1231_v55 = vadd.f32 %v1229_v54, %v1226_v53 }
 0xab3   :  { %1233 = vrot.lane.b32.xlu0 %v1231_v55, %s4059_s9 }
 0xab4   :  { %v1237_v58 = vpop.permute.xlu1 %1236 }
 0xab7   :  { %1240 = vrot.lane.b32.xlu0 %v3977_v36, %s4061_s28  ;;  %v4559_v36 = vld [vmem:[%s4832_s1 + $0x20] sm:$0xff] }
 0xab8   :  { %v1406_v1 = vpop.permute.xlu1 %1405 }
 0xb25   :  { %v1234_v57 = vpop.permute.xlu0 %1233 }
 0xb26   :  { %v1243_v59 = vsel %vm32_vm2, %v1234_v57, %v1237_v58  ;;  %v1408_v2 = vsel %vm32_vm2, %v1234_v57, %v1406_v1 }
 0xb27   :  { %v1409_v4 = vsel %vm34_vm3, %v1408_v2, %v4148_v19 }
 0xb29   :  { %v1241_v60 = vpop.permute.xlu0 %1240 }
 0xb2a   :  { %v1244_v63 = vsel %vm224_vm6, %v1243_v59, %v1241_v60 }
 0xb2b   :  { %v1245_v0 = vsel %vm226_vm7, %v1244_v63, %v4261_v61 }
 0xb2c   :  { %3366 = vmatmul.mubr.msk.f32.vlgmr.msra.gmra.mrb[14].mxu0 %vm44_vm4, %v1245_v0 }
 0xb2d   :  { %3803 = vmatpush3.bf16.msra.mxu0 %v4106_v8  ;;  %3399 = vmatprep.mubr.msk.f32.mxu0 %vm4053_vm0, %v4054_v9 }
 0xb2e   :  { %3804 = vmatprep.subr.bf16.mxu0 %v4052_v3 }
 0xb31   :  { %3806 = vmatpush3.bf16.msra.mxu0 %v4114_v10 }
 0xb32   :  { %3807 = vmatprep.subr.bf16.mxu0 %v4052_v3 }
 0xb35   :  { %3809 = vmatpush3.bf16.msra.mxu0 %v4130_v14 }
 0xb36   :  { %3397 = vmatprep.subr.mxu0 %v4054_v9 }
 0xb39   :  { %3398 = vmatpush3.msra.mxu0 %v4140_v15 }
 0xb3a   :  { %3400 = vmatmul.mubr.msk.f32.vlgmr.msra.gmra.mrb[16].mxu0 %vm44_vm4, %v1409_v4  ;;  %3819 = vmatprep.subr.bf16.mxu0 %v4052_v3 }
 0xb3b   :  { %3821 = vmatpush3.bf16.msra.mxu0 %v4208_v39  ;;  %3433 = vmatprep.mubr.msk.f32.mxu0 %vm4053_vm0, %v4054_v9 }
 0xb3c   :  { %3822 = vmatprep.subr.bf16.mxu0 %v4052_v3 }
 0xb3f   :  { %3824 = vmatpush3.bf16.msra.mxu0 %v4214_v41 }
 0xb40   :  { %3825 = vmatprep.subr.bf16.mxu0 %v4052_v3 }
 0xb43   :  { %3827 = vmatpush3.bf16.msra.mxu0 %v4225_v46 }
 0xb44   :  { %3431 = vmatprep.subr.mxu0 %v4054_v9 }
 0xb47   :  { %3432 = vmatpush3.msra.mxu0 %v4235_v48 }
 0xb48   :  { %3837 = vmatprep.subr.bf16.mxu0 %v4052_v3 }
 0xbff   :  { %v1315_v7 = vpop.f32.mrb[14].mxu0 }
 0xc00   :  { %3982 = vtanh.f32 %v1315_v7  ;;  %v3367_v13 = vpop.f32.mrb[15].mxu0 }
 0xc0a   :  { %v3983_v16 = vpop.eup %3982 }
 0xc0b   :  { %v1320_v17 = vsel %vm122_vm5, %v3983_v16, %v4192_v33 }
 0xc0c   :  { %3383 = vmatmul.mubr.msk.f32.vlgmr.msra.gmra.mrb[14].mxu1 %vm44_vm4, %v1320_v17 }
 0xc0d   :  { %v1479_v18 = vpop.f32.mrb[16].mxu0  ;;  %3812 = vmatpush3.bf16.msra.mxu1 %v4161_v23  ;;  %3416 = vmatprep.mubr.msk.f32.mxu1 %vm4053_vm0, %v4054_v9 }
 0xc0e   :  { %3984 = vtanh.f32 %v1479_v18  ;;  %v3401_v20 = vpop.f32.mrb[17].mxu0  ;;  %3813 = vmatprep.subr.bf16.mxu1 %v4052_v3  ;;  %v4628_v18 = vld [vmem:[%s4832_s1 + $0x28] sm:$0xff] }
 0xc11   :  { %3815 = vmatpush3.bf16.msra.mxu1 %v4174_v27 }
 0xc12   :  { %3816 = vmatprep.subr.bf16.mxu1 %v4052_v3 }
 0xc15   :  { %3818 = vmatpush3.bf16.msra.mxu1 %v4180_v29 }
 0xc16   :  { %3414 = vmatprep.subr.mxu1 %v4054_v9 }
 0xc18   :  { %v3985_v21 = vpop.eup %3984 }
 0xc19   :  { %3415 = vmatpush3.msra.mxu1 %v4188_v30  ;;  %v1484_v22 = vsel %vm122_vm5, %v3985_v21, %v4192_v33 }
 0xc1a   :  { %3417 = vmatmul.mubr.msk.f32.vlgmr.msra.gmra.mrb[16].mxu1 %vm44_vm4, %v1484_v22  ;;  %3828 = vmatprep.subr.bf16.mxu1 %v4052_v3 }
 0xc1b   :  { %3830 = vmatpush3.bf16.msra.mxu1 %v4254_v56  ;;  %3450 = vmatprep.mubr.msk.f32.mxu1 %vm4053_vm0, %v4054_v9 }
 0xc1c   :  { %3831 = vmatprep.subr.bf16.mxu1 %v4052_v3 }
 0xc1f   :  { %3833 = vmatpush3.bf16.msra.mxu1 %v4299_v6 }
 0xc20   :  { %3834 = vmatprep.subr.bf16.mxu1 %v4052_v3 }
 0xc23   :  { %3836 = vmatpush3.bf16.msra.mxu1 %v4305_v11 }
 0xc24   :  { %3448 = vmatprep.subr.mxu1 %v4054_v9 }
 0xc27   :  { %3449 = vmatpush3.msra.mxu1 %v4313_v12 }
 0xc28   :  { %3846 = vmatprep.subr.bf16.mxu1 %v4052_v3 }
 0xcdf   :  { %v4550_v24 = vpop.f32.mrb[14].mxu1 }
 0xce0   :  { %v3384_v26 = vpop.f32.mrb[15].mxu1 }
 0xced   :  { %v1554_v28 = vpop.f32.mrb[16].mxu1 }
 0xcee   :  { %1562 = vrot.lane.b32.xlu0 %v1554_v28, %s4057_s30  ;;  %v3418_v31 = vpop.f32.mrb[17].mxu1  ;;  %v1558_v32 = vmul.f32 1.442695, %v1554_v28 }
 0xcf0   :  { %3986 = vpow2.f32 %v1558_v32 }
 0xcf2   :  { %1570 = vrot.lane.b32.xlu0 %v4490_v52, %s4057_s30 }
 0xcf6   :  { %1739 = vrot.lane.b32.xlu0 %v3985_v21, %s4057_s30 }
 0xcfa   :  { %v3987_v34 = vpop.eup %3986 }
 0xcfb   :  { %v1560_v37 = vmul.f32 %v3987_v34, %v4559_v36 }
 0xd60   :  { %v1563_v38 = vpop.permute.xlu0 %1562 }
 0xd61   :  { %v1565_v40 = vadd.f32 %v1563_v38, %v1560_v37 }
 0xd63   :  { %1567 = vrot.lane.b32.xlu1 %v1565_v40, %s4059_s9 }
 0xd64   :  { %v1571_v43 = vpop.permute.xlu0 %1570 }
 0xd67   :  { %1574 = vrot.lane.b32.xlu1 %v3983_v16, %s4061_s28 }
 0xd68   :  { %v1740_v51 = vpop.permute.xlu0 %1739 }
 0xdd5   :  { %v1568_v42 = vpop.permute.xlu1 %1567 }
 0xdd6   :  { %v1577_v45 = vsel %vm32_vm2, %v1568_v42, %v1571_v43  ;;  %v1742_v53 = vsel %vm32_vm2, %v1568_v42, %v1740_v51 }
 0xdd7   :  { %v1743_v54 = vsel %vm34_vm3, %v1742_v53, %v4148_v19 }
 0xdd9   :  { %v1575_v47 = vpop.permute.xlu1 %1574 }
 0xdda   :  { %v1578_v49 = vsel %vm224_vm6, %v1577_v45, %v1575_v47 }
 0xddb   :  { %v1579_v50 = vsel %vm226_vm7, %v1578_v49, %v4261_v61 }
 0xddc   :  { %3434 = vmatmul.mubr.msk.f32.vlgmr.msra.gmra.mrb[18].mxu0 %vm44_vm4, %v1579_v50 }
 0xddd   :  { %3839 = vmatpush3.bf16.msra.mxu0 %v4106_v8  ;;  %3467 = vmatprep.mubr.msk.f32.mxu0 %vm4053_vm0, %v4054_v9 }
 0xdde   :  { %3840 = vmatprep.subr.bf16.mxu0 %v4052_v3 }
 0xde1   :  { %3842 = vmatpush3.bf16.msra.mxu0 %v4114_v10 }
 0xde2   :  { %3843 = vmatprep.subr.bf16.mxu0 %v4052_v3 }
 0xde5   :  { %3845 = vmatpush3.bf16.msra.mxu0 %v4130_v14 }
 0xde6   :  { %3465 = vmatprep.subr.mxu0 %v4054_v9 }
 0xde9   :  { %3466 = vmatpush3.msra.mxu0 %v4140_v15 }
 0xdea   :  { %3468 = vmatmul.mubr.msk.f32.vlgmr.msra.gmra.mrb[20].mxu0 %vm44_vm4, %v1743_v54  ;;  %3855 = vmatprep.subr.bf16.mxu0 %v4052_v3 }
 0xdeb   :  { %3857 = vmatpush3.bf16.msra.mxu0 %v4208_v39  ;;  %3501 = vmatprep.mubr.msk.f32.mxu0 %vm4053_vm0, %v4054_v9 }
 0xdec   :  { %3858 = vmatprep.subr.bf16.mxu0 %v4052_v3 }
 0xdef   :  { %3860 = vmatpush3.bf16.msra.mxu0 %v4214_v41 }
 0xdf0   :  { %3861 = vmatprep.subr.bf16.mxu0 %v4052_v3 }
 0xdf3   :  { %3863 = vmatpush3.bf16.msra.mxu0 %v4225_v46 }
 0xdf4   :  { %3499 = vmatprep.subr.mxu0 %v4054_v9 }
 0xdf7   :  { %3500 = vmatpush3.msra.mxu0 %v4235_v48 }
 0xdf8   :  { %3873 = vmatprep.subr.bf16.mxu0 %v4052_v3 }
 0xeaf   :  { %v1649_v55 = vpop.f32.mrb[18].mxu0 }
 0xeb0   :  { %3988 = vtanh.f32 %v1649_v55  ;;  %v3435_v57 = vpop.f32.mrb[19].mxu0 }
 0xeba   :  { %v3989_v58 = vpop.eup %3988 }
 0xebb   :  { %v1654_v59 = vsel %vm122_vm5, %v3989_v58, %v4192_v33 }
 0xebc   :  { %3451 = vmatmul.mubr.msk.f32.vlgmr.msra.gmra.mrb[18].mxu1 %vm44_vm4, %v1654_v59 }
 0xebd   :  { %v1813_v60 = vpop.f32.mrb[20].mxu0  ;;  %3848 = vmatpush3.bf16.msra.mxu1 %v4161_v23  ;;  %3484 = vmatprep.mubr.msk.f32.mxu1 %vm4053_vm0, %v4054_v9 }
 0xebe   :  { %3990 = vtanh.f32 %v1813_v60  ;;  %v3469_v63 = vpop.f32.mrb[21].mxu0  ;;  %3849 = vmatprep.subr.bf16.mxu1 %v4052_v3  ;;  %v4697_v60 = vld [vmem:[%s4832_s1 + $0x30] sm:$0xff] }
 0xec1   :  { %3851 = vmatpush3.bf16.msra.mxu1 %v4174_v27 }
 0xec2   :  { %3852 = vmatprep.subr.bf16.mxu1 %v4052_v3 }
 0xec5   :  { %3854 = vmatpush3.bf16.msra.mxu1 %v4180_v29 }
 0xec6   :  { %3482 = vmatprep.subr.mxu1 %v4054_v9 }
 0xec8   :  { %v3991_v0 = vpop.eup %3990 }
 0xec9   :  { %3483 = vmatpush3.msra.mxu1 %v4188_v30  ;;  %v1818_v1 = vsel %vm122_vm5, %v3991_v0, %v4192_v33 }
 0xeca   :  { %3485 = vmatmul.mubr.msk.f32.vlgmr.msra.gmra.mrb[20].mxu1 %vm44_vm4, %v1818_v1  ;;  %3864 = vmatprep.subr.bf16.mxu1 %v4052_v3 }
 0xecb   :  { %3866 = vmatpush3.bf16.msra.mxu1 %v4254_v56  ;;  %3518 = vmatprep.mubr.msk.f32.mxu1 %vm4053_vm0, %v4054_v9 }
 0xecc   :  { %3867 = vmatprep.subr.bf16.mxu1 %v4052_v3 }
 0xecf   :  { %3869 = vmatpush3.bf16.msra.mxu1 %v4299_v6 }
 0xed0   :  { %3870 = vmatprep.subr.bf16.mxu1 %v4052_v3 }
 0xed3   :  { %3872 = vmatpush3.bf16.msra.mxu1 %v4305_v11 }
 0xed4   :  { %3516 = vmatprep.subr.mxu1 %v4054_v9 }
 0xed7   :  { %3517 = vmatpush3.msra.mxu1 %v4313_v12 }
 0xed8   :  { %3882 = vmatprep.subr.bf16.mxu1 %v4052_v3 }
 0xf8f   :  { %v4619_v2 = vpop.f32.mrb[18].mxu1 }
 0xf90   :  { %v3452_v4 = vpop.f32.mrb[19].mxu1 }
 0xf9d   :  { %v1888_v7 = vpop.f32.mrb[20].mxu1 }
 0xf9e   :  { %1896 = vrot.lane.b32.xlu1 %v1888_v7, %s4057_s30  ;;  %v3486_v13 = vpop.f32.mrb[21].mxu1  ;;  %v1892_v16 = vmul.f32 1.442695, %v1888_v7 }
 0xfa0   :  { %3992 = vpow2.f32 %v1892_v16 }
 0xfa2   :  { %1904 = vrot.lane.b32.xlu1 %v4559_v36, %s4057_s30 }
 0xfa6   :  { %2073 = vrot.lane.b32.xlu1 %v3991_v0, %s4057_s30 }
 0xfaa   :  { %v3993_v17 = vpop.eup %3992 }
 0xfab   :  { %v1894_v20 = vmul.f32 %v3993_v17, %v4628_v18 }
0x1010   :  { %v1897_v21 = vpop.permute.xlu1 %1896 }
0x1011   :  { %v1899_v22 = vadd.f32 %v1897_v21, %v1894_v20 }
0x1013   :  { %1901 = vrot.lane.b32.xlu0 %v1899_v22, %s4059_s9 }
0x1014   :  { %v1905_v28 = vpop.permute.xlu1 %1904 }
0x1017   :  { %1908 = vrot.lane.b32.xlu0 %v3989_v58, %s4061_s28 }
0x1018   :  { %v2074_v38 = vpop.permute.xlu1 %2073 }
0x1085   :  { %v1902_v26 = vpop.permute.xlu0 %1901 }
0x1086   :  { %v1911_v31 = vsel %vm32_vm2, %v1902_v26, %v1905_v28  ;;  %v2076_v40 = vsel %vm32_vm2, %v1902_v26, %v2074_v38 }
0x1087   :  { %v2077_v42 = vsel %vm34_vm3, %v2076_v40, %v4148_v19 }
0x1089   :  { %v1909_v32 = vpop.permute.xlu0 %1908 }
0x108a   :  { %v1912_v34 = vsel %vm224_vm6, %v1911_v31, %v1909_v32 }
0x108b   :  { %v1913_v37 = vsel %vm226_vm7, %v1912_v34, %v4261_v61 }
0x108c   :  { %3502 = vmatmul.mubr.msk.f32.vlgmr.msra.gmra.mrb[22].mxu0 %vm44_vm4, %v1913_v37 }
0x108d   :  { %3875 = vmatpush3.bf16.msra.mxu0 %v4106_v8  ;;  %3535 = vmatprep.mubr.msk.f32.mxu0 %vm4053_vm0, %v4054_v9 }
0x108e   :  { %3876 = vmatprep.subr.bf16.mxu0 %v4052_v3 }
0x1091   :  { %3878 = vmatpush3.bf16.msra.mxu0 %v4114_v10 }
0x1092   :  { %3879 = vmatprep.subr.bf16.mxu0 %v4052_v3 }
0x1095   :  { %3881 = vmatpush3.bf16.msra.mxu0 %v4130_v14 }
0x1096   :  { %3533 = vmatprep.subr.mxu0 %v4054_v9 }
0x1099   :  { %3534 = vmatpush3.msra.mxu0 %v4140_v15 }
0x109a   :  { %3536 = vmatmul.mubr.msk.f32.vlgmr.msra.gmra.mrb[24].mxu0 %vm44_vm4, %v2077_v42  ;;  %3891 = vmatprep.subr.bf16.mxu0 %v4052_v3 }
0x109b   :  { %3893 = vmatpush3.bf16.msra.mxu0 %v4208_v39  ;;  %3569 = vmatprep.mubr.msk.f32.mxu0 %vm4053_vm0, %v4054_v9 }
0x109c   :  { %3894 = vmatprep.subr.bf16.mxu0 %v4052_v3 }
0x109f   :  { %3896 = vmatpush3.bf16.msra.mxu0 %v4214_v41 }
0x10a0   :  { %3897 = vmatprep.subr.bf16.mxu0 %v4052_v3 }
0x10a3   :  { %3899 = vmatpush3.bf16.msra.mxu0 %v4225_v46 }
0x10a4   :  { %3567 = vmatprep.subr.mxu0 %v4054_v9 }
0x10a7   :  { %3568 = vmatpush3.msra.mxu0 %v4235_v48 }
0x10a8   :  { %3909 = vmatprep.subr.bf16.mxu0 %v4052_v3 }
0x115f   :  { %v1983_v15 = vpop.f32.mrb[22].mxu0 }
0x1160   :  { %3994 = vtanh.f32 %v1983_v15  ;;  %v3503_v43 = vpop.f32.mrb[23].mxu0 }
0x116a   :  { %v3995_v45 = vpop.eup %3994 }
0x116b   :  { %v1988_v47 = vsel %vm122_vm5, %v3995_v45, %v4192_v33 }
0x116c   :  { %3519 = vmatmul.mubr.msk.f32.vlgmr.msra.gmra.mrb[22].mxu1 %vm44_vm4, %v1988_v47 }
0x116d   :  { %v2147_v49 = vpop.f32.mrb[24].mxu0  ;;  %3884 = vmatpush3.bf16.msra.mxu1 %v4161_v23  ;;  %3552 = vmatprep.mubr.msk.f32.mxu1 %vm4053_vm0, %v4054_v9 }
0x116e   :  { %3996 = vtanh.f32 %v2147_v49  ;;  %v3537_v50 = vpop.f32.mrb[25].mxu0  ;;  %3885 = vmatprep.subr.bf16.mxu1 %v4052_v3 }
0x1171   :  { %3887 = vmatpush3.bf16.msra.mxu1 %v4174_v27 }
0x1172   :  { %3888 = vmatprep.subr.bf16.mxu1 %v4052_v3 }
0x1175   :  { %3890 = vmatpush3.bf16.msra.mxu1 %v4180_v29 }
0x1176   :  { %3550 = vmatprep.subr.mxu1 %v4054_v9 }
0x1178   :  { %v3997_v51 = vpop.eup %3996 }
0x1179   :  { %3551 = vmatpush3.msra.mxu1 %v4188_v30  ;;  %v2152_v53 = vsel %vm122_vm5, %v3997_v51, %v4192_v33 }
0x117a   :  { %3553 = vmatmul.mubr.msk.f32.vlgmr.msra.gmra.mrb[24].mxu1 %vm44_vm4, %v2152_v53  ;;  %3900 = vmatprep.subr.bf16.mxu1 %v4052_v3 }
0x117b   :  { %3902 = vmatpush3.bf16.msra.mxu1 %v4254_v56  ;;  %3586 = vmatprep.mubr.msk.f32.mxu1 %vm4053_vm0, %v4054_v9 }
0x117c   :  { %3903 = vmatprep.subr.bf16.mxu1 %v4052_v3 }
0x117f   :  { %3905 = vmatpush3.bf16.msra.mxu1 %v4299_v6 }
0x1180   :  { %3906 = vmatprep.subr.bf16.mxu1 %v4052_v3 }
0x1183   :  { %3908 = vmatpush3.bf16.msra.mxu1 %v4305_v11 }
0x1184   :  { %3584 = vmatprep.subr.mxu1 %v4054_v9 }
0x1187   :  { %3585 = vmatpush3.msra.mxu1 %v4313_v12 }
0x1188   :  { %3918 = vmatprep.subr.bf16.mxu1 %v4052_v3 }
0x123f   :  { %v4688_v30 = vpop.f32.mrb[22].mxu1 }
0x1240   :  { %v3520_v54 = vpop.f32.mrb[23].mxu1  ;;  %v2062_v37 = vmul.f32 1.442695, %v4688_v30 }
0x124d   :  { %v2222_v55 = vpop.f32.mrb[24].mxu1 }
0x124e   :  { %2230 = vrot.lane.b32.xlu0 %v2222_v55, %s4057_s30  ;;  %v3554_v57 = vpop.f32.mrb[25].mxu1  ;;  %v2226_v58 = vmul.f32 1.442695, %v2222_v55 }
0x1250   :  { %3998 = vpow2.f32 %v2226_v58 }
0x1252   :  { %2238 = vrot.lane.b32.xlu0 %v4628_v18, %s4057_s30 }
0x1256   :  { %2407 = vrot.lane.b32.xlu0 %v3997_v51, %s4057_s30 }
0x125a   :  { %v3999_v59 = vpop.eup %3998 }
0x125b   :  { %v2228_v63 = vmul.f32 %v3999_v59, %v4697_v60 }
0x12c0   :  { %v2231_v0 = vpop.permute.xlu0 %2230 }
0x12c1   :  { %v2233_v1 = vadd.f32 %v2231_v0, %v2228_v63 }
0x12c3   :  { %2235 = vrot.lane.b32.xlu1 %v2233_v1, %s4059_s9 }
0x12c4   :  { %v2239_v7 = vpop.permute.xlu0 %2238 }
0x12c7   :  { %2242 = vrot.lane.b32.xlu1 %v3995_v45, %s4061_s28 }
0x12c8   :  { %v2408_v21 = vpop.permute.xlu0 %2407 }
0x1335   :  { %v2236_v4 = vpop.permute.xlu1 %2235 }
0x1336   :  { %v2245_v13 = vsel %vm32_vm2, %v2236_v4, %v2239_v7  ;;  %v2410_v22 = vsel %vm32_vm2, %v2236_v4, %v2408_v21 }
0x1337   :  { %v2411_v26 = vsel %vm34_vm3, %v2410_v22, %v4148_v19 }
0x1339   :  { %v2243_v16 = vpop.permute.xlu1 %2242 }
0x133a   :  { %v2246_v17 = vsel %vm224_vm6, %v2245_v13, %v2243_v16 }
0x133b   :  { %v2247_v20 = vsel %vm226_vm7, %v2246_v17, %v4261_v61 }
0x133c   :  { %3570 = vmatmul.mubr.msk.f32.vlgmr.msra.gmra.mrb[26].mxu0 %vm44_vm4, %v2247_v20 }
0x133d   :  { %3911 = vmatpush3.bf16.msra.mxu0 %v4106_v8  ;;  %3603 = vmatprep.mubr.msk.f32.mxu0 %vm4053_vm0, %v4054_v9  ;;  %v4024_v8 = vld [vmem:[%s4831_s0 + $0x68] sm:$0xff] }
0x133e   :  { %3912 = vmatprep.subr.bf16.mxu0 %v4052_v3 }
0x1341   :  { %3914 = vmatpush3.bf16.msra.mxu0 %v4114_v10 }
0x1342   :  { %3915 = vmatprep.subr.bf16.mxu0 %v4052_v3 }
0x1345   :  { %3917 = vmatpush3.bf16.msra.mxu0 %v4130_v14 }
0x1346   :  { %3601 = vmatprep.subr.mxu0 %v4054_v9 }
0x1349   :  { %3602 = vmatpush3.msra.mxu0 %v4024_v8 }
0x134a   :  { %3604 = vmatmul.mubr.msk.f32.vlgmr.msra.gmra.mrb[28].mxu0 %vm44_vm4, %v2411_v26  ;;  %3927 = vmatprep.subr.bf16.mxu0 %v4052_v3 }
0x134b   :  { %3929 = vmatpush3.bf16.msra.mxu0 %v4208_v39  ;;  %3637 = vmatprep.mubr.msk.f32.mxu0 %vm4053_vm0, %v4054_v9 }
0x134c   :  { %3930 = vmatprep.subr.bf16.mxu0 %v4052_v3 }
0x134f   :  { %3932 = vmatpush3.bf16.msra.mxu0 %v4214_v41 }
0x1350   :  { %3933 = vmatprep.subr.bf16.mxu0 %v4052_v3 }
0x1353   :  { %3935 = vmatpush3.bf16.msra.mxu0 %v4225_v46 }
0x1354   :  { %3635 = vmatprep.subr.mxu0 %v4054_v9 }
0x1357   :  { %3636 = vmatpush3.msra.mxu0 %v4235_v48 }
0x140f   :  { %v2317_v10 = vpop.f32.mrb[26].mxu0 }
0x1410   :  { %4000 = vtanh.f32 %v2317_v10  ;;  %v3571_v14 = vpop.f32.mrb[27].mxu0 }
0x141a   :  { %v4001_v19 = vpop.eup %4000 }
0x141b   :  { %v2322_v39 = vsel %vm122_vm5, %v4001_v19, %v4192_v33 }
0x141c   :  { %3587 = vmatmul.mubr.msk.f32.vlgmr.msra.gmra.mrb[26].mxu1 %vm44_vm4, %v2322_v39 }
0x141d   :  { %v2481_v28 = vpop.f32.mrb[28].mxu0  ;;  %3920 = vmatpush3.bf16.msra.mxu1 %v4161_v23  ;;  %3620 = vmatprep.mubr.msk.f32.mxu1 %vm4053_vm0, %v4054_v9  ;;  %v4025_v23 = vld [vmem:[%s4831_s0 + $0xa0] sm:$0xff]  ;;  %s4062_s0 = smov 112  }
0x141e   :  { %4002 = vtanh.f32 %v2481_v28  ;;  %v3605_v41 = vpop.f32.mrb[29].mxu0  ;;  %3921 = vmatprep.subr.bf16.mxu1 %v4052_v3 }
0x141f   :  { %v392_v41 = vmul.f32 1.442695, %v4343_v25 }
0x1421   :  { %3923 = vmatpush3.bf16.msra.mxu1 %v4174_v27 }
0x1422   :  { %3924 = vmatprep.subr.bf16.mxu1 %v4052_v3 }
0x1425   :  { %3926 = vmatpush3.bf16.msra.mxu1 %v4180_v29 }
0x1426   :  { %3618 = vmatprep.subr.mxu1 %v4054_v9 }
0x1428   :  { %v4003_v46 = vpop.eup %4002 }
0x1429   :  { %3619 = vmatpush3.msra.mxu1 %v4025_v23  ;;  %v2486_v48 = vsel %vm122_vm5, %v4003_v46, %v4192_v33 }
0x142a   :  { %3621 = vmatmul.mubr.msk.f32.vlgmr.msra.gmra.mrb[28].mxu1 %vm44_vm4, %v2486_v48  ;;  %3936 = vmatprep.subr.bf16.mxu1 %v4052_v3 }
0x142b   :  { %3938 = vmatpush3.bf16.msra.mxu1 %v4254_v56  ;;  %3654 = vmatprep.mubr.msk.f32.mxu1 %vm4053_vm0, %v4054_v9 }
0x142c   :  { %3939 = vmatprep.subr.bf16.mxu1 %v4052_v3 }
0x142f   :  { %3941 = vmatpush3.bf16.msra.mxu1 %v4299_v6 }
0x1430   :  { %3942 = vmatprep.subr.bf16.mxu1 %v4052_v3  ;;  %v2852_v3 = vld [vmem:[%s4832_s1 + $0x38] sm:$0xff] }
0x1433   :  { %3944 = vmatpush3.bf16.msra.mxu1 %v4305_v11  ;;  %v726_v11 = vmul.f32 1.442695, %v4412_v62 }
0x1434   :  { %3652 = vmatprep.subr.mxu1 %v4054_v9 }
0x1437   :  { %3653 = vmatpush3.msra.mxu1 %v4313_v12  ;;  %v1394_v12 = vmul.f32 1.442695, %v4550_v24 }
0x14ef   :  { %v4759_v27 = vpop.f32.mrb[26].mxu1 }
0x14f0   :  { %v3588_v29 = vpop.f32.mrb[27].mxu1 }
0x14fd   :  { %v2556_v31 = vpop.f32.mrb[28].mxu1 }
0x14fe   :  { %v2560_v56 = vmul.f32 1.442695, %v2556_v31  ;;  %2564 = vrot.lane.b32.xlu1 %v2556_v31, %s4057_s30  ;;  %v3622_v32 = vpop.f32.mrb[29].mxu1 }
0x1500   :  { %4004 = vpow2.f32 %v2560_v56 }
0x1501   :  { %4006 = vpow2.f32 %v726_v11 }
0x1502   :  { %2572 = vrot.lane.b32.xlu1 %v4697_v60, %s4057_s30  ;;  %4008 = vpow2.f32 %v1394_v12 }
0x1503   :  { %4010 = vpow2.f32 %v2062_v37 }
0x1506   :  { %729 = vrot.lane.b32.xlu1 %v4352_v35, %s4062_s0 }
0x150a   :  { %v4005_v9 = vpop.eup %4004  ;;  %1397 = vrot.lane.b32.xlu1 %v4490_v52, %s4062_s0 }
0x150b   :  { %v2562_v6 = vmul.f32 %v4005_v9, %v2852_v3  ;;  %v4007_v52 = vpop.eup %4006 }
0x150c   :  { %v4009_v15 = vpop.eup %4008 }
0x150d   :  { %v4011_v49 = vpop.eup %4010 }
0x150e   :  { %2065 = vrot.lane.b32.xlu1 %v4628_v18, %s4062_s0 }
0x1512   :  { %2733 = vrot.lane.b32.xlu1 %v2852_v3, %s4062_s0 }
0x1570   :  { %v2565_v35 = vpop.permute.xlu1 %2564 }
0x1571   :  { %v2567_v34 = vadd.f32 %v2565_v35, %v2562_v6 }
0x1573   :  { %2569 = vrot.lane.b32.xlu0 %v2567_v34, %s4059_s9  ;;  %s4063_s9 = smov 24  }
0x1574   :  { %v2573_v38 = vpop.permute.xlu1 %2572 }
0x1577   :  { %2576 = vrot.lane.b32.xlu0 %v4001_v19, %s4061_s28 }
0x1578   :  { %v730_v18 = vpop.permute.xlu1 %729 }
0x1579   :  { %v732_v40 = vmul.f32 %v4007_v52, %v730_v18 }
0x157b   :  { %v733_v42 = vadd.f32 %v732_v40, %v4412_v62  ;;  %1063 = vrot.lane.b32.xlu0 %v4421_v5, %s4062_s0  ;;  %v4026_v5 = vld [vmem:[%s4832_s1] sm:$0xff]  ;;  %s4064_s1 = smov 56  }
0x157c   :  { %v1398_v43 = vpop.permute.xlu1 %1397 }
0x157d   :  { %v1400_v45 = vmul.f32 %v4009_v15, %v1398_v43  ;;  %2739 = vrot.lane.b32.xlu1 %v733_v42, %s4057_s30 }
0x157f   :  { %v1401_v47 = vadd.f32 %v1400_v45, %v4550_v24  ;;  %1731 = vrot.lane.b32.xlu0 %v4559_v36, %s4062_s0  ;;  %v1060_v24 = vmul.f32 1.442695, %v4481_v44  ;;  %v1728_v36 = vmul.f32 1.442695, %v4619_v2 }
0x1580   :  { %v2066_v50 = vpop.permute.xlu1 %2065 }
0x1581   :  { %v2068_v51 = vmul.f32 %v4011_v49, %v2066_v50  ;;  %2747 = vrot.lane.b32.xlu1 %v1401_v47, %s4063_s9  ;;  %4012 = vpow2.f32 %v1060_v24 }
0x1582   :  { %4014 = vpow2.f32 %v1728_v36 }
0x1583   :  { %v2069_v62 = vadd.f32 %v2068_v51, %v4688_v30  ;;  %2399 = vrot.lane.b32.xlu0 %v4697_v60, %s4062_s0  ;;  %v2396_v30 = vmul.f32 1.442695, %v4759_v27 }
0x1584   :  { %v2734_v19 = vpop.permute.xlu1 %2733 }
0x1585   :  { %2755 = vrot.lane.b32.xlu1 %v2069_v62, %s4056_s27  ;;  %4016 = vpow2.f32 %v2396_v30 }
0x1587   :  { %395 = vrot.lane.b32.xlu0 %v4026_v5, %s4062_s0 }
0x158b   :  { %v4013_v59 = vpop.eup %4012 }
0x158c   :  { %v4015_v1 = vpop.eup %4014 }
0x158f   :  { %v4017_v16 = vpop.eup %4016 }
0x15e5   :  { %v2570_v53 = vpop.permute.xlu0 %2569 }
0x15e6   :  { %v2579_v54 = vsel %vm32_vm2, %v2570_v53, %v2573_v38 }
0x15e9   :  { %v2577_v55 = vpop.permute.xlu0 %2576 }
0x15ea   :  { %v2580_v57 = vsel %vm224_vm6, %v2579_v54, %v2577_v55 }
0x15eb   :  { %v2581_v58 = vsel %vm226_vm7, %v2580_v57, %v4261_v61 }
0x15ec   :  { %3638 = vmatmul.mubr.msk.f32.vlgmr.msra.gmra.mrb[30].mxu0 %vm44_vm4, %v2581_v58 }
0x15ed   :  { %v1064_v60 = vpop.permute.xlu0 %1063 }
0x15ee   :  { %v1066_v63 = vmul.f32 %v4013_v59, %v1064_v60 }
0x15f0   :  { %v1067_v0 = vadd.f32 %v1066_v63, %v4481_v44 }
0x15f1   :  { %v1732_v4 = vpop.permute.xlu0 %1731 }
0x15f2   :  { %v1734_v7 = vmul.f32 %v4015_v1, %v1732_v4  ;;  %2743 = vrot.lane.b32.xlu0 %v1067_v0, %s4061_s28 }
0x15f4   :  { %v1735_v13 = vadd.f32 %v1734_v7, %v4619_v2 }
0x15f5   :  { %v2400_v17 = vpop.permute.xlu0 %2399 }
0x15f6   :  { %v2402_v20 = vmul.f32 %v4017_v16, %v2400_v17  ;;  %2751 = vrot.lane.b32.xlu0 %v1735_v13, %s4051_s16  ;;  %s4065_s16 = smov [#allocation2]  }
0x15f7   :  { %s2782_s27 = sshll.u32 %s4065_s16, 4  ;;  %s2783_s27 = int_to_ptr.vmem [resolvable:$true] %s2782_s27 }
0x15f8   :  { %v2403_v61 = vadd.f32 %v2402_v20, %v4759_v27  ;;  %v2740_v27 = vpop.permute.xlu1 %2739  ;;  %s4027_s30 = scalar_lea.vmem %s2783_s27, 128  ;;  %p4032_p1 = scmp.lt.s32.totalorder %s2783_s27, %s2783_s27 }
0x15f9   :  { %v396_v46 = vpop.permute.xlu0 %395  ;;  %p4028_p0 = scmp.ne.s32.totalorder %s2783_s27, %s4027_s30  ;;  %p4033_p2 = scmp.lt.s32.totalorder %s4027_s30, %s4027_s30 }
0x15fa   :  { %2759 = vrot.lane.b32.xlu0 %v2403_v61, %s4060_s10 }
0x15fb   :  { %p4034_p3 = por %p4033_p2, %p4032_p1 }
0x15fc   :  { %v2748_v31 = vpop.permute.xlu1 %2747 }
0x15fd   :  { %p4035_p4 = pnand %p4034_p3, %p4028_p0 }
0x1600   :  { %v2756_v6 = vpop.permute.xlu1 %2755 }
0x16bf   :  { %v2651_v21 = vpop.f32.mrb[30].mxu0 }
0x16c0   :  { %4018 = vtanh.f32 %v2651_v21  ;;  %v3639_v22 = vpop.f32.mrb[31].mxu0 }
0x16ca   :  { %v4019_v44 = vpop.eup %4018 }
0x16cb   :  { %v2656_v26 = vsel %vm122_vm5, %v4019_v44, %v4192_v33  ;;  %v2744_v33 = vpop.permute.xlu0 %2743 }
0x16cc   :  { %3655 = vmatmul.mubr.msk.f32.vlgmr.msra.gmra.mrb[30].mxu1 %vm44_vm4, %v2656_v26 }
0x16cf   :  { %v2752_v32 = vpop.permute.xlu0 %2751 }
0x16d3   :  { %v2760_v12 = vpop.permute.xlu0 %2759 }
0x179f   :  { %v2726_v8 = vpop.f32.mrb[30].mxu1 }
0x17a0   :  { %v2730_v2 = vmul.f32 1.442695, %v2726_v8  ;;  %v3656_v10 = vpop.f32.mrb[31].mxu1 }
0x17a2   :  { %4020 = vpow2.f32 %v2730_v2 }
0x17a3   :  { %4022 = vpow2.f32 %v392_v41 }
0x17ac   :  { %v4021_v14 = vpop.eup %4020 }
0x17ad   :  { %v2736_v39 = vmul.f32 %v4021_v14, %v2734_v19  ;;  %v4023_v23 = vpop.eup %4022 }
0x17ae   :  { %v398_v48 = vmul.f32 %v4023_v23, %v396_v46 }
0x17af   :  { %v2737_v28 = vadd.f32 %v2736_v39, %v2726_v8 }
0x17b0   :  { %v399_v29 = vadd.f32 %v398_v48, %v4343_v25 }
0x17b1   :  { %2763 = vrot.lane.b32.xlu1 %v2737_v28, %s4064_s1 }
0x17b2   :  { %v2766_v56 = vsel %vm32_vm2, %v399_v29, %v2740_v27 }
0x17b3   :  { %v2767_v3 = vsel %vm224_vm6, %v2766_v56, %v2744_v33 }
0x17b4   :  { %v2769_v9 = vsel %vm2768_vm8, %v2767_v3, %v2748_v31 }
0x17b5   :  { %v2770_v11 = vsel %vm122_vm5, %v2769_v9, %v2752_v32 }
0x17b6   :  { %v2771_v35 = vsel %vm34_vm3, %v2770_v11, %v2756_v6 }
0x17b7   :  { %v2772_v34 = vsel %vm226_vm7, %v2771_v35, %v2760_v12 }
0x1823   :  { %v2764_v25 = vpop.permute.xlu1 %2763 }
0x1824   :  { %v2773_v37 = vsel %vm44_vm4, %v2772_v34, %v2764_v25 }
0x1825   :  { %2775 = vst.msk [vmem:[#allocation2] sm:$0xff] %vm2774_vm9, %v2773_v37 }
0x1826   :  { %4038 = shalt.err (!%p4035_p4)
}
0x1827   :  { %s4039_s24 = scalar_lea.hbm %s4834_s3, 128 }
0x1828   :  { %p4040_p5 = scmp.ne.s32.totalorder %s4834_s3, %s4039_s24  ;;  %p4043_p6 = scmp.lt.u32.totalorder %s4039_s24, %s4834_s3 }
0x182a   :  { %p4045_p7 = pnand %p4043_p6, %p4040_p5 }
0x182c   :  { %4048 = shalt.err (!%p4045_p7)
}
0x182d   :  { %2785 = dma.vmem_to_hbm [thread:$0]  %s2783_s27, 128, %s4834_s3, [#allocation3]  }
0x182e   :  { %4049 = dma.done.wait [#allocation3], 128  }
0x182f   :  { %4050 = vsyncadd [#allocation3], 4294967168 }
0x1830   :  { %2789 = vsyncpa [#allocation3], 1 }

</bundles_post_ra>
